<compile_context>
chip_gen: v7x
topology: tpu7x:2x2x1
jax: 0.10.0
libtpu: 0.0.40
codegen_flags: <defaults>
</compile_context>

<pallas_src>
import functools

import jax
import jax.numpy as jnp
from jax import lax
from jax.experimental import pallas as pl
from jax.experimental.pallas import tpu as pltpu


def lsh_att_kernel(
    x_ref,            # (N, D) f32        current batch block
    wq_ref,           # (H, D, Dh) bf16   1/sqrt(Dh) pre-folded
    wk_ref,           # (H, D, Dh) bf16
    wvo_ref,          # (H, D, D)  bf16   Wv_h @ Wo_h pre-folded
    vecs_ref,         # (8, D) f32        rows: bo,g1,be1,g2,be2,bf1,bf2,pad
    wf1_ref,          # (D, D) bf16
    wf2_ref,          # (D, D) bf16
    out_ref,          # (N, D) f32
    *, num_heads, bf16_softmax,
):
    eps = 1e-5
    x = x_ref[...].astype(jnp.float32)                         # (N, D)
    n, d = x.shape

    bo = vecs_ref[0:1]
    g1, be1 = vecs_ref[1:2], vecs_ref[2:3]
    g2, be2 = vecs_ref[3:4], vecs_ref[4:5]
    bf1, bf2 = vecs_ref[5:6], vecs_ref[6:7]

    # ---- LayerNorm 1 (norm1), f32 math ----
    mu = jnp.mean(x, axis=-1, keepdims=True)
    var = jnp.mean(jnp.square(x - mu), axis=-1, keepdims=True)
    xn = (x - mu) * lax.rsqrt(var + eps) * g1 + be1
    xn_b = xn.astype(jnp.bfloat16)                             # bf16 MXU operand

    # ---- Multi-head attention core (dense softmax; see TODO above) ----
    def head_body(h, aggr):
        # Per-head weights via dynamic leading-axis ref indexing (zero layout
        # cost, no lane slicing of activations).
        q_h = jnp.dot(xn_b, wq_ref[h], preferred_element_type=jnp.float32)    # scale pre-folded
        k_h = jnp.dot(xn_b, wk_ref[h], preferred_element_type=jnp.float32)
        vw_h = jnp.dot(xn_b, wvo_ref[h], preferred_element_type=jnp.float32)  # (N, D) = xn @ (Wv Wo)

        # Scores without materializing k_h.T: contract the last dims directly.
        s = lax.dot_general(
            q_h.astype(jnp.bfloat16), k_h.astype(jnp.bfloat16),
            (((1,), (1,)), ((), ())),
            preferred_element_type=jnp.float32)                # (N, N)
        s = s - jnp.max(s, axis=-1, keepdims=True)

        if bf16_softmax:       # v6e / v7x: bf16 EUP/VPU, halves p vreg footprint
            p = jnp.exp(s.astype(jnp.bfloat16))
            denom = jnp.sum(p, axis=-1, keepdims=True, dtype=jnp.float32)
        else:                  # v5e and older: no bf16 VPU/EUP, keep f32
            p32 = jnp.exp(s)
            denom = jnp.sum(p32, axis=-1, keepdims=True)
            p = p32.astype(jnp.bfloat16)

        o_h = jnp.dot(p, vw_h.astype(jnp.bfloat16),
                      preferred_element_type=jnp.float32)      # (N, D), K = N
        # Deferred softmax normalization on the small (N, D) head output.
        return aggr + o_h * pl.reciprocal(denom, approx=True)

    aggr = lax.fori_loop(0, num_heads, head_body, jnp.zeros((n, d), jnp.float32))

    # ---- Residual 1 (Dropout(p=0.1) == identity in eval) ----
    x1 = x + aggr + bo

    # ---- LayerNorm 2 (norm2) + feed-forward ----
    mu2 = jnp.mean(x1, axis=-1, keepdims=True)
    var2 = jnp.mean(jnp.square(x1 - mu2), axis=-1, keepdims=True)
    xn2 = (x1 - mu2) * lax.rsqrt(var2 + eps) * g2 + be2

    h1 = jnp.dot(xn2.astype(jnp.bfloat16), wf1_ref[...],
                 preferred_element_type=jnp.float32) + bf1
    h1 = jnp.maximum(h1, 0.0)                                  # ReLU
    ff = jnp.dot(h1.astype(jnp.bfloat16), wf2_ref[...],
                 preferred_element_type=jnp.float32) + bf2

    # ---- Residual 2 ----
    out_ref[...] = (x1 + ff).astype(out_ref.dtype)


def prepare_lsh_att_params(params, *, num_heads, dim_per_head):
    """One-time host-side weight repacking (hoisted out of the per-call path)."""
    wq, wk, wv, wo, bo, g1, be1, g2, be2, wf1, bf1, wf2, bf2 = params
    D, H, Dh = dim_per_head, num_heads, dim_per_head
    scale = 1.0 / float(Dh) ** 0.5

    def to_heads_in(w):                                        # (D, H*Dh) -> (H, D, Dh)
        return w.reshape(D, H, Dh).transpose(1, 0, 2)

    wq_h = (to_heads_in(wq) * scale).astype(jnp.bfloat16)      # 1/sqrt(Dh) folded into Wq
    wk_h = to_heads_in(wk).astype(jnp.bfloat16)
    # Fold the output projection into the value projection (f32 product, then
    # a single bf16 cast):  (xn @ Wv_h) @ Wo_h == xn @ (Wv_h @ Wo_h).
    wv_h = to_heads_in(wv)                                     # (H, D, Dh) f32
    wo_h = wo.reshape(H, Dh, D)                                # (H, Dh, D) f32
    wvo_h = jnp.einsum("hdk,hko->hdo", wv_h, wo_h).astype(jnp.bfloat16)  # (H, D, D)
    # Stack the seven tiny (1, D) vectors into one (8, D) operand (one DMA).
    vecs = jnp.concatenate(
        [bo, g1, be1, g2, be2, bf1, bf2, jnp.zeros_like(bo)], axis=0)
    return (wq_h, wk_h, wvo_h, vecs,
            wf1.astype(jnp.bfloat16), wf2.astype(jnp.bfloat16))


@functools.partial(jax.jit,
                   static_argnames=("num_heads", "dim_per_head", "bf16_softmax"))
def lsh_att_forward(x, packed, *, num_heads, dim_per_head, bf16_softmax):
    # x: (B, N, D).  `coords` is deliberately not an operand (see TODO above).
    B, N, D = x.shape
    assert D == dim_per_head
    wq_h, wk_h, wvo_h, vecs, wf1_b, wf2_b = packed

    kernel = functools.partial(
        lsh_att_kernel, num_heads=num_heads, bf16_softmax=bf16_softmax)

    def whole(a):
        # Constant index_map -> block index never changes -> DMA'd once and
        # kept resident across all grid steps.
        nd = a.ndim
        return pl.BlockSpec(a.shape, lambda b, nd=nd: (0,) * nd)

    # Advisory cost: ~12 MFLOP / ~66K transcendentals per block.
    flops_blk = num_heads * (3 * 2 * N * D * D + 2 * 2 * N * N * D) + 2 * 2 * N * D * D
    transc_blk = num_heads * (N * N + N) + 2 * N
    weight_bytes = sum(int(a.size) * int(a.dtype.itemsize) for a in packed)
    bytes_acc = 2 * int(x.size) * 4 + weight_bytes

    return pl.pallas_call(
        kernel,
        out_shape=jax.ShapeDtypeStruct((B, N, D), x.dtype),
        grid=(B,),
        in_specs=[
            pl.BlockSpec((None, N, D), lambda b: (b, 0, 0)),   # x: one block per step
            whole(wq_h), whole(wk_h), whole(wvo_h), whole(vecs),
            whole(wf1_b), whole(wf2_b),
        ],
        out_specs=pl.BlockSpec((None, N, D), lambda b: (b, 0, 0)),
        # x (input 0) has the output's shape/dtype; each grid step only reads
        # its own block before writing it back, so aliasing is safe.
        input_output_aliases={0: 0},
        compiler_params=pltpu.CompilerParams(
            dimension_semantics=("parallel",)),                # v7x: both TCs
        cost_estimate=pl.CostEstimate(
            flops=flops_blk * B,
            transcendentals=transc_blk * B,
            bytes_accessed=bytes_acc),
    )(x, wq_h, wk_h, wvo_h, vecs, wf1_b, wf2_b)


# --------------------------- pure-JAX reference ---------------------------

def _lsh_att_reference_block(x, params, *, num_heads, dim_per_head):
    """f32 reference for one (N, D) block (dense attention, eval-mode)."""
    wq, wk, wv, wo, bo, g1, be1, g2, be2, wf1, bf1, wf2, bf2 = params
    eps = 1e-5

    def ln(z, g, b):
        mu = z.mean(-1, keepdims=True)
        var = ((z - mu) ** 2).mean(-1, keepdims=True)
        return (z - mu) / jnp.sqrt(var + eps) * g + b

    xn = ln(x, g1, be1)
    q, k, v = xn @ wq, xn @ wk, xn @ wv
    scale = 1.0 / float(dim_per_head) ** 0.5
    outs = []
    for h in range(num_heads):
        sl = slice(h * dim_per_head, (h + 1) * dim_per_head)
        s = (q[:, sl] @ k[:, sl].T) * scale
        p = jax.nn.softmax(s, axis=-1)
        outs.append(p @ v[:, sl])
    aggr = jnp.concatenate(outs, axis=-1) @ wo + bo
    x1 = x + aggr
    xn2 = ln(x1, g2, be2)
    ff = jnp.maximum(xn2 @ wf1 + bf1, 0.0) @ wf2 + bf2
    return x1 + ff


def lsh_att_reference(x, params, *, num_heads, dim_per_head):
    fn = functools.partial(_lsh_att_reference_block, params=params,
                           num_heads=num_heads, dim_per_head=dim_per_head)
    return jax.vmap(fn)(x)


if __name__ == "__main__":
    # Shapes implied by the module: h_dim=32, num_heads=4; N=128 points per
    # block, batched B=4 blocks through the grid.
    B, N, D, H = 4, 128, 32, 4
    coords_dim = 6
    num_w_per_dist = 8

    key = jax.random.PRNGKey(0)
    keys = jax.random.split(key, 16)

    def lin(k, shape):
        return jax.random.normal(k, shape, jnp.float32) * 0.02

    x = jax.random.normal(keys[0], (B, N, D), jnp.float32)
    # TODO(synk): `coords` only feeds the undefined HEPTAttention LSH/RPE path;
    # it is deliberately not consumed by the kernel.
    coords = jax.random.normal(keys[1], (B, N, coords_dim), jnp.float32)

    # Weights stored as (in, out) so y = x @ W.
    wq = lin(keys[2], (D, H * D))
    wk = lin(keys[3], (D, H * D))
    wv = lin(keys[4], (D, H * D))
    wo = lin(keys[5], (H * D, D))            # HEPTAttention internal output proj
    bo = jnp.zeros((1, D), jnp.float32)

    g1 = jnp.ones((1, D), jnp.float32)       # norm1 gamma
    be1 = jnp.zeros((1, D), jnp.float32)     # norm1 beta
    g2 = jnp.ones((1, D), jnp.float32)       # norm2 gamma
    be2 = jnp.zeros((1, D), jnp.float32)     # norm2 beta

    wf1 = lin(keys[6], (D, D))               # ff[0]
    bf1 = lin(keys[7], (1, D))
    wf2 = lin(keys[8], (D, D))               # ff[2]
    bf2 = lin(keys[9], (1, D))

    # Declared in __init__ but only consumed inside the (undefined) HEPTAttention:
    w_rpe_w = lin(keys[10], (num_w_per_dist * (coords_dim - 1), H * D))
    w_rpe_b = jnp.zeros((1, H * D), jnp.float32)
    del w_rpe_w, w_rpe_b  # TODO(synk): unused — HEPTAttention RPE path not defined in source.

    params = (wq, wk, wv, wo, bo, g1, be1, g2, be2, wf1, bf1, wf2, bf2)

    # One-time weight repacking (init-time, not per call).
    packed = prepare_lsh_att_params(params, num_heads=H, dim_per_head=D)

    # bf16 softmax/exp only on generations with a bf16 VPU/EUP (v6e, v7x, ...).
    kind = jax.devices()[0].device_kind.lower()
    bf16_softmax = not any(g in kind for g in ("v2", "v3", "v4", "v5"))

    ref = lsh_att_reference(x, params, num_heads=H, dim_per_head=D)
    out = lsh_att_forward(x, packed, num_heads=H, dim_per_head=D,
                          bf16_softmax=bf16_softmax)
    jax.block_until_ready(out)

    assert out.shape == (B, N, D) and out.dtype == jnp.float32
    assert bool(jnp.all(jnp.isfinite(out)))
    # bf16 MXU operands + folded Wv@Wo + approx reciprocal -> loose tolerance
    # vs the f32 reference.
    max_err = float(jnp.max(jnp.abs(out - ref)))
    assert max_err < 2e-2, f"max abs error {max_err}"
    print("KERNEL_OK")
</pallas_src>

<mosaic_0001>
module attributes {stable_mosaic.version = 11 : i64} {
  func.func @lsh_att_kernel(%arg0: i32, %arg1: memref<1x128x32xf32, #tpu.memory_space<vmem>>, %arg2: memref<4x32x32xbf16, #tpu.memory_space<vmem>>, %arg3: memref<4x32x32xbf16, #tpu.memory_space<vmem>>, %arg4: memref<4x32x32xbf16, #tpu.memory_space<vmem>>, %arg5: memref<8x32xf32, #tpu.memory_space<vmem>>, %arg6: memref<32x32xbf16, #tpu.memory_space<vmem>>, %arg7: memref<32x32xbf16, #tpu.memory_space<vmem>>, %arg8: memref<1x128x32xf32, #tpu.memory_space<vmem>>) attributes {dimension_semantics = [#tpu.dimension_semantics<parallel>], iteration_bounds = array<i64: 4>, scalar_prefetch = 0 : i64, scratch_operands = 0 : i64, tpu.core_type = #tpu.core_type<tc>, window_params = [{transform_indices = @transform_0, window_bounds = array<i64: 1, 128, 32>}, {pipeline_mode = #tpu.pipeline_mode<synchronous>, transform_indices = @transform_1, window_bounds = array<i64: 4, 32, 32>}, {pipeline_mode = #tpu.pipeline_mode<synchronous>, transform_indices = @transform_2, window_bounds = array<i64: 4, 32, 32>}, {pipeline_mode = #tpu.pipeline_mode<synchronous>, transform_indices = @transform_3, window_bounds = array<i64: 4, 32, 32>}, {pipeline_mode = #tpu.pipeline_mode<synchronous>, transform_indices = @transform_4, window_bounds = array<i64: 8, 32>}, {pipeline_mode = #tpu.pipeline_mode<synchronous>, transform_indices = @transform_5, window_bounds = array<i64: 32, 32>}, {pipeline_mode = #tpu.pipeline_mode<synchronous>, transform_indices = @transform_6, window_bounds = array<i64: 32, 32>}, {transform_indices = @transform_7, window_bounds = array<i64: 1, 128, 32>}]} {
    %c0 = arith.constant 0 : index
    %c0_0 = arith.constant 0 : index
    %c0_1 = arith.constant 0 : index
    %0 = vector.load %arg1[%c0, %c0_0, %c0_1] : memref<1x128x32xf32, #tpu.memory_space<vmem>>, vector<1x128x32xf32>
    %1 = vector.shape_cast %0 : vector<1x128x32xf32> to vector<128x32xf32>
    %c0_2 = arith.constant 0 : index
    %c0_3 = arith.constant 0 : index
    %2 = vector.load %arg5[%c0_2, %c0_3] : memref<8x32xf32, #tpu.memory_space<vmem>>, vector<1x32xf32>
    %c1 = arith.constant 1 : index
    %c0_4 = arith.constant 0 : index
    %3 = vector.load %arg5[%c1, %c0_4] : memref<8x32xf32, #tpu.memory_space<vmem>>, vector<1x32xf32>
    %c2 = arith.constant 2 : index
    %c0_5 = arith.constant 0 : index
    %4 = vector.load %arg5[%c2, %c0_5] : memref<8x32xf32, #tpu.memory_space<vmem>>, vector<1x32xf32>
    %c3 = arith.constant 3 : index
    %c0_6 = arith.constant 0 : index
    %5 = vector.load %arg5[%c3, %c0_6] : memref<8x32xf32, #tpu.memory_space<vmem>>, vector<1x32xf32>
    %c4 = arith.constant 4 : index
    %c0_7 = arith.constant 0 : index
    %6 = vector.load %arg5[%c4, %c0_7] : memref<8x32xf32, #tpu.memory_space<vmem>>, vector<1x32xf32>
    %c5 = arith.constant 5 : index
    %c0_8 = arith.constant 0 : index
    %7 = vector.load %arg5[%c5, %c0_8] : memref<8x32xf32, #tpu.memory_space<vmem>>, vector<1x32xf32>
    %c6 = arith.constant 6 : index
    %c0_9 = arith.constant 0 : index
    %8 = vector.load %arg5[%c6, %c0_9] : memref<8x32xf32, #tpu.memory_space<vmem>>, vector<1x32xf32>
    %cst = arith.constant dense<0.000000e+00> : vector<128xf32>
    %9 = vector.multi_reduction <add>, %1, %cst [1] : vector<128x32xf32> to vector<128xf32>
    %10 = vector.shape_cast %9 : vector<128xf32> to vector<128x1xf32>
    %cst_10 = arith.constant 3.200000e+01 : f32
    %11 = vector.broadcast %cst_10 : f32 to vector<128x1xf32>
    %12 = arith.divf %10, %11 : vector<128x1xf32>
    %13 = vector.broadcast %12 : vector<128x1xf32> to vector<128x32xf32>
    %14 = arith.subf %1, %13 : vector<128x32xf32>
    %15 = arith.mulf %14, %14 : vector<128x32xf32>
    %cst_11 = arith.constant dense<0.000000e+00> : vector<128xf32>
    %16 = vector.multi_reduction <add>, %15, %cst_11 [1] : vector<128x32xf32> to vector<128xf32>
    %17 = vector.shape_cast %16 : vector<128xf32> to vector<128x1xf32>
    %cst_12 = arith.constant 3.200000e+01 : f32
    %18 = vector.broadcast %cst_12 : f32 to vector<128x1xf32>
    %19 = arith.divf %17, %18 : vector<128x1xf32>
    %20 = vector.broadcast %12 : vector<128x1xf32> to vector<128x32xf32>
    %21 = arith.subf %1, %20 : vector<128x32xf32>
    %cst_13 = arith.constant 9.99999974E-6 : f32
    %22 = vector.broadcast %cst_13 : f32 to vector<128x1xf32>
    %23 = arith.addf %19, %22 : vector<128x1xf32>
    %24 = math.rsqrt %23 : vector<128x1xf32>
    %25 = vector.broadcast %24 : vector<128x1xf32> to vector<128x32xf32>
    %26 = arith.mulf %21, %25 : vector<128x32xf32>
    %27 = vector.broadcast %3 : vector<1x32xf32> to vector<128x32xf32>
    %28 = arith.mulf %26, %27 : vector<128x32xf32>
    %29 = vector.broadcast %4 : vector<1x32xf32> to vector<128x32xf32>
    %30 = arith.addf %28, %29 : vector<128x32xf32>
    %31 = arith.truncf %30 : vector<128x32xf32> to vector<128x32xbf16>
    %cst_14 = arith.constant 0.000000e+00 : f32
    %32 = vector.broadcast %cst_14 : f32 to vector<128x32xf32>
    %c0_i32 = arith.constant 0 : i32
    %c4_i32 = arith.constant 4 : i32
    %33 = arith.addi %c0_i32, %c4_i32 : i32
    %c1_i32 = arith.constant 1 : i32
    %34 = scf.for %arg9 = %c0_i32 to %33 step %c1_i32 iter_args(%arg10 = %32) -> (vector<128x32xf32>)  : i32 {
      %76 = arith.index_cast %arg9 : i32 to index
      %c0_31 = arith.constant 0 : index
      %c0_32 = arith.constant 0 : index
      %77 = vector.load %arg2[%76, %c0_31, %c0_32] : memref<4x32x32xbf16, #tpu.memory_space<vmem>>, vector<1x32x32xbf16>
      %78 = vector.shape_cast %77 : vector<1x32x32xbf16> to vector<32x32xbf16>
      %cst_33 = arith.constant dense<0.000000e+00> : vector<128x32xf32>
      %79 = tpu.matmul %31, %78, %cst_33 {dimension_numbers = #tpu.dot_dimension_numbers<[1], [0], [0], [1], [0, 0, 1, 1], [], []>} : vector<128x32xbf16>, vector<32x32xbf16>, vector<128x32xf32> -> vector<128x32xf32>
      %80 = arith.index_cast %arg9 : i32 to index
      %c0_34 = arith.constant 0 : index
      %c0_35 = arith.constant 0 : index
      %81 = vector.load %arg3[%80, %c0_34, %c0_35] : memref<4x32x32xbf16, #tpu.memory_space<vmem>>, vector<1x32x32xbf16>
      %82 = vector.shape_cast %81 : vector<1x32x32xbf16> to vector<32x32xbf16>
      %cst_36 = arith.constant dense<0.000000e+00> : vector<128x32xf32>
      %83 = tpu.matmul %31, %82, %cst_36 {dimension_numbers = #tpu.dot_dimension_numbers<[1], [0], [0], [1], [0, 0, 1, 1], [], []>} : vector<128x32xbf16>, vector<32x32xbf16>, vector<128x32xf32> -> vector<128x32xf32>
      %84 = arith.index_cast %arg9 : i32 to index
      %c0_37 = arith.constant 0 : index
      %c0_38 = arith.constant 0 : index
      %85 = vector.load %arg4[%84, %c0_37, %c0_38] : memref<4x32x32xbf16, #tpu.memory_space<vmem>>, vector<1x32x32xbf16>
      %86 = vector.shape_cast %85 : vector<1x32x32xbf16> to vector<32x32xbf16>
      %cst_39 = arith.constant dense<0.000000e+00> : vector<128x32xf32>
      %87 = tpu.matmul %31, %86, %cst_39 {dimension_numbers = #tpu.dot_dimension_numbers<[1], [0], [0], [1], [0, 0, 1, 1], [], []>} : vector<128x32xbf16>, vector<32x32xbf16>, vector<128x32xf32> -> vector<128x32xf32>
      %88 = arith.truncf %79 : vector<128x32xf32> to vector<128x32xbf16>
      %89 = arith.truncf %83 : vector<128x32xf32> to vector<128x32xbf16>
      %cst_40 = arith.constant dense<0.000000e+00> : vector<128x128xf32>
      %90 = tpu.matmul %88, %89, %cst_40 {dimension_numbers = #tpu.dot_dimension_numbers<[1], [1], [0], [0], [0, 0, 1, 0], [], []>} : vector<128x32xbf16>, vector<128x32xbf16>, vector<128x128xf32> -> vector<128x128xf32>
      %cst_41 = arith.constant dense<0xFF800000> : vector<128xf32>
      %91 = vector.multi_reduction <maximumf>, %90, %cst_41 [1] : vector<128x128xf32> to vector<128xf32>
      %92 = vector.shape_cast %91 : vector<128xf32> to vector<128x1xf32>
      %93 = vector.broadcast %92 : vector<128x1xf32> to vector<128x128xf32>
      %94 = arith.subf %90, %93 : vector<128x128xf32>
      %95 = arith.truncf %94 : vector<128x128xf32> to vector<128x128xbf16>
      %96 = math.exp %95 : vector<128x128xbf16>
      %97 = arith.extf %96 : vector<128x128xbf16> to vector<128x128xf32>
      %cst_42 = arith.constant dense<0.000000e+00> : vector<128xf32>
      %98 = vector.multi_reduction <add>, %97, %cst_42 [1] : vector<128x128xf32> to vector<128xf32>
      %99 = vector.shape_cast %98 : vector<128xf32> to vector<128x1xf32>
      %100 = arith.truncf %87 : vector<128x32xf32> to vector<128x32xbf16>
      %cst_43 = arith.constant dense<0.000000e+00> : vector<128x32xf32>
      %101 = tpu.matmul %96, %100, %cst_43 {dimension_numbers = #tpu.dot_dimension_numbers<[1], [0], [0], [1], [0, 0, 1, 1], [], []>} : vector<128x128xbf16>, vector<128x32xbf16>, vector<128x32xf32> -> vector<128x32xf32>
      %102 = tpu.reciprocal %99 {approx = true} : vector<128x1xf32> -> vector<128x1xf32>
      %103 = vector.broadcast %102 : vector<128x1xf32> to vector<128x32xf32>
      %104 = arith.mulf %101, %103 : vector<128x32xf32>
      %105 = arith.addf %arg10, %104 : vector<128x32xf32>
      scf.yield %105 : vector<128x32xf32>
    }
    %c4_i32_15 = arith.constant 4 : i32
    %35 = arith.addf %1, %34 : vector<128x32xf32>
    %36 = vector.broadcast %2 : vector<1x32xf32> to vector<128x32xf32>
    %37 = arith.addf %35, %36 : vector<128x32xf32>
    %cst_16 = arith.constant dense<0.000000e+00> : vector<128xf32>
    %38 = vector.multi_reduction <add>, %37, %cst_16 [1] : vector<128x32xf32> to vector<128xf32>
    %39 = vector.shape_cast %38 : vector<128xf32> to vector<128x1xf32>
    %cst_17 = arith.constant 3.200000e+01 : f32
    %40 = vector.broadcast %cst_17 : f32 to vector<128x1xf32>
    %41 = arith.divf %39, %40 : vector<128x1xf32>
    %42 = vector.broadcast %41 : vector<128x1xf32> to vector<128x32xf32>
    %43 = arith.subf %37, %42 : vector<128x32xf32>
    %44 = arith.mulf %43, %43 : vector<128x32xf32>
    %cst_18 = arith.constant dense<0.000000e+00> : vector<128xf32>
    %45 = vector.multi_reduction <add>, %44, %cst_18 [1] : vector<128x32xf32> to vector<128xf32>
    %46 = vector.shape_cast %45 : vector<128xf32> to vector<128x1xf32>
    %cst_19 = arith.constant 3.200000e+01 : f32
    %47 = vector.broadcast %cst_19 : f32 to vector<128x1xf32>
    %48 = arith.divf %46, %47 : vector<128x1xf32>
    %49 = vector.broadcast %41 : vector<128x1xf32> to vector<128x32xf32>
    %50 = arith.subf %37, %49 : vector<128x32xf32>
    %cst_20 = arith.constant 9.99999974E-6 : f32
    %51 = vector.broadcast %cst_20 : f32 to vector<128x1xf32>
    %52 = arith.addf %48, %51 : vector<128x1xf32>
    %53 = math.rsqrt %52 : vector<128x1xf32>
    %54 = vector.broadcast %53 : vector<128x1xf32> to vector<128x32xf32>
    %55 = arith.mulf %50, %54 : vector<128x32xf32>
    %56 = vector.broadcast %5 : vector<1x32xf32> to vector<128x32xf32>
    %57 = arith.mulf %55, %56 : vector<128x32xf32>
    %58 = vector.broadcast %6 : vector<1x32xf32> to vector<128x32xf32>
    %59 = arith.addf %57, %58 : vector<128x32xf32>
    %60 = arith.truncf %59 : vector<128x32xf32> to vector<128x32xbf16>
    %c0_21 = arith.constant 0 : index
    %c0_22 = arith.constant 0 : index
    %61 = vector.load %arg6[%c0_21, %c0_22] : memref<32x32xbf16, #tpu.memory_space<vmem>>, vector<32x32xbf16>
    %cst_23 = arith.constant dense<0.000000e+00> : vector<128x32xf32>
    %62 = tpu.matmul %60, %61, %cst_23 {dimension_numbers = #tpu.dot_dimension_numbers<[1], [0], [0], [1], [0, 0, 1, 1], [], []>} : vector<128x32xbf16>, vector<32x32xbf16>, vector<128x32xf32> -> vector<128x32xf32>
    %63 = vector.broadcast %7 : vector<1x32xf32> to vector<128x32xf32>
    %64 = arith.addf %62, %63 : vector<128x32xf32>
    %cst_24 = arith.constant 0.000000e+00 : f32
    %65 = vector.broadcast %cst_24 : f32 to vector<128x32xf32>
    %66 = arith.maximumf %64, %65 : vector<128x32xf32>
    %67 = arith.truncf %66 : vector<128x32xf32> to vector<128x32xbf16>
    %c0_25 = arith.constant 0 : index
    %c0_26 = arith.constant 0 : index
    %68 = vector.load %arg7[%c0_25, %c0_26] : memref<32x32xbf16, #tpu.memory_space<vmem>>, vector<32x32xbf16>
    %cst_27 = arith.constant dense<0.000000e+00> : vector<128x32xf32>
    %69 = tpu.matmul %67, %68, %cst_27 {dimension_numbers = #tpu.dot_dimension_numbers<[1], [0], [0], [1], [0, 0, 1, 1], [], []>} : vector<128x32xbf16>, vector<32x32xbf16>, vector<128x32xf32> -> vector<128x32xf32>
    %70 = vector.broadcast %8 : vector<1x32xf32> to vector<128x32xf32>
    %71 = arith.addf %69, %70 : vector<128x32xf32>
    %72 = arith.addf %37, %71 : vector<128x32xf32>
    %c0_28 = arith.constant 0 : index
    %c0_29 = arith.constant 0 : index
    %c0_30 = arith.constant 0 : index
    %73 = vector.load %arg8[%c0_28, %c0_29, %c0_30] : memref<1x128x32xf32, #tpu.memory_space<vmem>>, vector<1x128x32xf32>
    %74 = vector.shape_cast %73 : vector<1x128x32xf32> to vector<128x32xf32>
    %75 = vector.shape_cast %72 : vector<128x32xf32> to vector<1x128x32xf32>
    tpu.vector_store %arg8[%c0_28, %c0_29, %c0_30], %75 {strides = array<i32>} : memref<1x128x32xf32, #tpu.memory_space<vmem>>, vector<1x128x32xf32>,
    return
  }
  func.func @transform_0(%arg0: i32) -> (i32, i32, i32) {
    %c0_i32 = arith.constant 0 : i32
    %c0_i32_0 = arith.constant 0 : i32
    %c0_i32_1 = arith.constant 0 : i32
    return %arg0, %c0_i32, %c0_i32_0 : i32, i32, i32
  }
  func.func @transform_1(%arg0: i32) -> (i32, i32, i32) {
    %c0_i32 = arith.constant 0 : i32
    %c0_i32_0 = arith.constant 0 : i32
    %c0_i32_1 = arith.constant 0 : i32
    %c0_i32_2 = arith.constant 0 : i32
    return %c0_i32, %c0_i32_0, %c0_i32_1 : i32, i32, i32
  }
  func.func @transform_2(%arg0: i32) -> (i32, i32, i32) {
    %c0_i32 = arith.constant 0 : i32
    %c0_i32_0 = arith.constant 0 : i32
    %c0_i32_1 = arith.constant 0 : i32
    %c0_i32_2 = arith.constant 0 : i32
    return %c0_i32, %c0_i32_0, %c0_i32_1 : i32, i32, i32
  }
  func.func @transform_3(%arg0: i32) -> (i32, i32, i32) {
    %c0_i32 = arith.constant 0 : i32
    %c0_i32_0 = arith.constant 0 : i32
    %c0_i32_1 = arith.constant 0 : i32
    %c0_i32_2 = arith.constant 0 : i32
    return %c0_i32, %c0_i32_0, %c0_i32_1 : i32, i32, i32
  }
  func.func @transform_4(%arg0: i32) -> (i32, i32) {
    %c0_i32 = arith.constant 0 : i32
    %c0_i32_0 = arith.constant 0 : i32
    %c0_i32_1 = arith.constant 0 : i32
    return %c0_i32, %c0_i32_0 : i32, i32
  }
  func.func @transform_5(%arg0: i32) -> (i32, i32) {
    %c0_i32 = arith.constant 0 : i32
    %c0_i32_0 = arith.constant 0 : i32
    %c0_i32_1 = arith.constant 0 : i32
    return %c0_i32, %c0_i32_0 : i32, i32
  }
  func.func @transform_6(%arg0: i32) -> (i32, i32) {
    %c0_i32 = arith.constant 0 : i32
    %c0_i32_0 = arith.constant 0 : i32
    %c0_i32_1 = arith.constant 0 : i32
    return %c0_i32, %c0_i32_0 : i32, i32
  }
  func.func @transform_7(%arg0: i32) -> (i32, i32, i32) {
    %c0_i32 = arith.constant 0 : i32
    %c0_i32_0 = arith.constant 0 : i32
    %c0_i32_1 = arith.constant 0 : i32
    return %arg0, %c0_i32, %c0_i32_0 : i32, i32, i32
  }
}

</mosaic_0001>

<bundles_post_ra>
// kernel: lsh_att_forward.1
= control target key start
LH: loop header
LB: loop body
LE: loop exit
PB: predicated region body
PF: predicated region fallthrough
CT: control target
= control target key end

     0   :  { %s2928_s24 = smov 0   ;;  %s3886_s0 = inlined_call_operand.vmem [shape: f32[4,128,32], index: 0, kind: input, shape index: {}, may-alias: {0,7}]   ;;  %s3887_s1 = inlined_call_operand.vmem [shape: bf16[4,32,32], index: 1, kind: input, shape index: {}]   ;;  %s3888_s2 = inlined_call_operand.vmem [shape: bf16[4,32,32], index: 2, kind: input, shape index: {}]   ;;  %s3889_s3 = inlined_call_operand.vmem [shape: bf16[4,32,32], index: 3, kind: input, shape index: {}]   ;;  %s3890_s4 = inlined_call_operand.vmem [shape: f32[8,32], index: 4, kind: input, shape index: {}]   ;;  %s3891_s5 = inlined_call_operand.vmem [shape: bf16[32,32], index: 5, kind: input, shape index: {}]   ;;  %s3892_s6 = inlined_call_operand.vmem [shape: bf16[32,32], index: 6, kind: input, shape index: {}]   ;;  %s3893_s7 = inlined_call_operand.vmem [shape: f32[4,128,32], index: 7, kind: output, shape index: {}, may-alias: {0,7}]  }
   0x1 LB: > { %s2139_s25 = sadd.s32 4294967295, %s2818_s24   ;;  %p2143_p0 = scmp.ge.s32.totalorder %s2818_s24, 1  ;;  %s2818_s24 = sphi %s2928_s24, %s17_s24  }
   0x2   : > { %p237_p1 = scmp.lt.s32.totalorder %s2818_s24, 5 }
   0x4   : > { %p238_p2 = pnand %p2143_p0, %p237_p1 }
   0x6   : > { %241 = sbr.rel (%p238_p2) target bundleno = 2070 (0x816), region = 48 }
   0xd   : > { %p269_p3 = scmp.lt.s32.totalorder %s2139_s25, 3  ;;  %vm303_vm0 = vcmask 261120  }
   0xf   : > { %s3980_s25 = smov (!%p269_p3, %s2139_s25), 3 }
  0x10   : > { %s2219_s26 = sshll.u32 %s3980_s25, 7  ;;  %s3253_s25 = smov 0  }
  0x11   : > { %s2939_s29 = scalar_lea.vmem %s3886_s0, %s2219_s26  ;;  %s2944_s9 = scalar_lea.vmem %s3893_s7, %s2219_s26 }
  0x12   : > { %v2947_v0 = vld [vmem:[%s2939_s29] sm:$0xff]  ;;  %v2950_v1 = vld [vmem:[%s2939_s29 + $0x10] sm:$0xff]  ;;  %v2953_v2 = vld [vmem:[%s2939_s29 + $0x8] sm:$0xff] }
  0x13   : > { %v304_v3 = vsel %vm303_vm0, %v2947_v0, 0.0  ;;  %v310_v4 = vsel %vm303_vm0, %v2950_v1, 0.0  ;;  %v2960_v5 = vld [vmem:[%s2939_s29 + $0x18] sm:$0xff]  ;;  %v307_v6 = vsel %vm303_vm0, %v2953_v2, 0.0  ;;  %v2967_v8 = vld [vmem:[%s2939_s29 + $0x20] sm:$0xff]  ;;  %v2970_v9 = vld [vmem:[%s2939_s29 + $0x28] sm:$0xff] }
  0x14   : > { %305 = vadd.xlane.f32.xlu0 %v304_v3  ;;  %311 = vadd.xlane.f32.xlu1 %v310_v4  ;;  %v313_v7 = vsel %vm303_vm0, %v2960_v5, 0.0  ;;  %v316_v10 = vsel %vm303_vm0, %v2967_v8, 0.0  ;;  %v319_v11 = vsel %vm303_vm0, %v2970_v9, 0.0  ;;  %v2977_v12 = vld [vmem:[%s2939_s29 + $0x30] sm:$0xff]  ;;  %v2980_v13 = vld [vmem:[%s2939_s29 + $0x38] sm:$0xff]  ;;  %v2987_v16 = vld [vmem:[%s2939_s29 + $0x40] sm:$0xff] }
  0x15   : > { %v322_v14 = vsel %vm303_vm0, %v2977_v12, 0.0  ;;  %v325_v15 = vsel %vm303_vm0, %v2980_v13, 0.0  ;;  %v2990_v17 = vld [vmem:[%s2939_s29 + $0x48] sm:$0xff]  ;;  %v328_v18 = vsel %vm303_vm0, %v2987_v16, 0.0  ;;  %v2997_v20 = vld [vmem:[%s2939_s29 + $0x50] sm:$0xff]  ;;  %v3000_v21 = vld [vmem:[%s2939_s29 + $0x58] sm:$0xff] }
  0x16   : > { %v331_v19 = vsel %vm303_vm0, %v2990_v17, 0.0  ;;  %3912 = vst [vmem:[#allocation2_spill] sm:$0xff] %v2997_v20  ;;  %3913 = vst [vmem:[#allocation3_spill] sm:$0xff] %v3000_v21  ;;  %v334_v22 = vsel %vm303_vm0, %v2997_v20, 0.0  ;;  %v337_v23 = vsel %vm303_vm0, %v3000_v21, 0.0  ;;  %v3007_v24 = vld [vmem:[%s2939_s29 + $0x60] sm:$0xff] }
  0x17   : > { %3914 = vst [vmem:[#allocation4_spill] sm:$0xff] %v3007_v24  ;;  %v3010_v25 = vld [vmem:[%s2939_s29 + $0x68] sm:$0xff]  ;;  %v340_v26 = vsel %vm303_vm0, %v3007_v24, 0.0  ;;  %v3017_v28 = vld [vmem:[%s2939_s29 + $0x70] sm:$0xff]  ;;  %v3020_v29 = vld [vmem:[%s2939_s29 + $0x78] sm:$0xff] }
  0x18   : > { %308 = vadd.xlane.f32.xlu0 %v307_v6  ;;  %314 = vadd.xlane.f32.xlu1 %v313_v7  ;;  %3915 = vst [vmem:[#allocation5_spill] sm:$0xff] %v3010_v25  ;;  %v343_v27 = vsel %vm303_vm0, %v3010_v25, 0.0  ;;  %3916 = vst [vmem:[#allocation6_spill] sm:$0xff] %v3017_v28  ;;  %v346_v30 = vsel %vm303_vm0, %v3017_v28, 0.0  ;;  %v349_v31 = vsel %vm303_vm0, %v3020_v29, 0.0 }
  0x19   : > { %3917 = vst [vmem:[#allocation7_spill] sm:$0xff] %v3020_v29 }
  0x1c   : > { %317 = vadd.xlane.f32.xlu0 %v316_v10  ;;  %320 = vadd.xlane.f32.xlu1 %v319_v11 }
  0x20   : > { %323 = vadd.xlane.f32.xlu0 %v322_v14  ;;  %326 = vadd.xlane.f32.xlu1 %v325_v15 }
  0x24   : > { %329 = vadd.xlane.f32.xlu0 %v328_v18  ;;  %332 = vadd.xlane.f32.xlu1 %v331_v19 }
  0x28   : > { %335 = vadd.xlane.f32.xlu0 %v334_v22  ;;  %338 = vadd.xlane.f32.xlu1 %v337_v23 }
  0x2c   : > { %341 = vadd.xlane.f32.xlu0 %v340_v26  ;;  %344 = vadd.xlane.f32.xlu1 %v343_v27 }
  0x30   : > { %347 = vadd.xlane.f32.xlu0 %v346_v30  ;;  %350 = vadd.xlane.f32.xlu1 %v349_v31 }
  0xa1   : > { %v306_v32 = vpop.xlane.xlu0 %305  ;;  %v312_v33 = vpop.xlane.xlu1 %311 }
  0xa2   : > { %v353_v34 = vmul.f32 0.03125, %v306_v32  ;;  %v355_v35 = vmul.f32 0.03125, %v312_v33 }
  0xa4   : > { %v3027_v36 = vsub.f32 %v2947_v0, %v353_v34  ;;  %v3030_v37 = vsub.f32 %v2950_v1, %v355_v35 }
  0xa5   : > { %v309_v38 = vpop.xlane.xlu0 %308  ;;  %v315_v39 = vpop.xlane.xlu1 %314 }
  0xa6   : > { %v354_v40 = vmul.f32 0.03125, %v309_v38  ;;  %v356_v41 = vmul.f32 0.03125, %v315_v39  ;;  %v385_v42 = vmul.f32 %v3027_v36, %v3027_v36  ;;  %v387_v43 = vmul.f32 %v3030_v37, %v3030_v37 }
  0xa8   : > { %v3037_v44 = vsub.f32 %v2953_v2, %v354_v40  ;;  %v3040_v45 = vsub.f32 %v2960_v5, %v356_v41  ;;  %v401_v46 = vsel %vm303_vm0, %v385_v42, 0.0  ;;  %v407_v49 = vsel %vm303_vm0, %v387_v43, 0.0 }
  0xa9   : > { %402 = vadd.xlane.f32.xlu0 %v401_v46  ;;  %v318_v47 = vpop.xlane.xlu0 %317  ;;  %v321_v48 = vpop.xlane.xlu1 %320 }
  0xaa   : > { %v357_v50 = vmul.f32 0.03125, %v318_v47  ;;  %v358_v51 = vmul.f32 0.03125, %v321_v48  ;;  %v386_v52 = vmul.f32 %v3037_v44, %v3037_v44  ;;  %v388_v53 = vmul.f32 %v3040_v45, %v3040_v45 }
  0xac   : > { %v3049_v54 = vsub.f32 %v2967_v8, %v357_v50  ;;  %v3052_v55 = vsub.f32 %v2970_v9, %v358_v51  ;;  %v404_v56 = vsel %vm303_vm0, %v386_v52, 0.0  ;;  %v410_v59 = vsel %vm303_vm0, %v388_v53, 0.0 }
  0xad   : > { %408 = vadd.xlane.f32.xlu0 %v407_v49  ;;  %405 = vadd.xlane.f32.xlu1 %v404_v56  ;;  %v324_v57 = vpop.xlane.xlu0 %323  ;;  %v327_v58 = vpop.xlane.xlu1 %326 }
  0xae   : > { %v359_v60 = vmul.f32 0.03125, %v324_v57  ;;  %v360_v61 = vmul.f32 0.03125, %v327_v58  ;;  %v389_v62 = vmul.f32 %v3049_v54, %v3049_v54  ;;  %v390_v63 = vmul.f32 %v3052_v55, %v3052_v55 }
  0xb0   : > { %v3061_v3 = vsub.f32 %v2977_v12, %v359_v60  ;;  %v3064_v4 = vsub.f32 %v2980_v13, %v360_v61  ;;  %v413_v6 = vsel %vm303_vm0, %v389_v62, 0.0  ;;  %v416_v11 = vsel %vm303_vm0, %v390_v63, 0.0 }
  0xb1   : > { %411 = vadd.xlane.f32.xlu1 %v410_v59  ;;  %414 = vadd.xlane.f32.xlu0 %v413_v6  ;;  %v330_v7 = vpop.xlane.xlu0 %329  ;;  %v333_v10 = vpop.xlane.xlu1 %332 }
  0xb2   : > { %v361_v14 = vmul.f32 0.03125, %v330_v7  ;;  %v362_v15 = vmul.f32 0.03125, %v333_v10  ;;  %v391_v18 = vmul.f32 %v3061_v3, %v3061_v3  ;;  %v392_v19 = vmul.f32 %v3064_v4, %v3064_v4 }
  0xb4   : > { %v3073_v22 = vsub.f32 %v2987_v16, %v361_v14  ;;  %v3076_v23 = vsub.f32 %v2990_v17, %v362_v15  ;;  %v419_v26 = vsel %vm303_vm0, %v391_v18, 0.0  ;;  %v422_v31 = vsel %vm303_vm0, %v392_v19, 0.0  ;;  %v3125_v18 = vld [vmem:[%s3890_s4] ss:$0 sm:$0xff]  ;;  %v3130_v19 = vld [vmem:[%s3890_s4 + $0x3] ss:$0 sm:$0xff] }
  0xb5   : > { %417 = vadd.xlane.f32.xlu1 %v416_v11  ;;  %420 = vadd.xlane.f32.xlu0 %v419_v26  ;;  %v336_v27 = vpop.xlane.xlu0 %335  ;;  %v339_v30 = vpop.xlane.xlu1 %338  ;;  %3918 = vst [vmem:[#allocation8_spill] sm:$0xff] %v3130_v19  ;;  %v3135_v26 = vld [vmem:[%s3890_s4 + $0x4] ss:$0 sm:$0xff] }
  0xb6   : > { %v363_v32 = vmul.f32 0.03125, %v336_v27  ;;  %v364_v33 = vmul.f32 0.03125, %v339_v30  ;;  %v393_v34 = vmul.f32 %v3073_v22, %v3073_v22  ;;  %v394_v35 = vmul.f32 %v3076_v23, %v3076_v23  ;;  %3919 = vst [vmem:[#allocation9_spill] sm:$0xff] %v3135_v26  ;;  %v3140_v27 = vld [vmem:[%s3890_s4 + $0x5] ss:$0 sm:$0xff] }
  0xb7   : > { %3920 = vst [vmem:[#allocation10_spill] sm:$0xff] %v3140_v27  ;;  %v3145_v30 = vld [vmem:[%s3890_s4 + $0x6] ss:$0 sm:$0xff] }
  0xb8   : > { %v3085_v38 = vsub.f32 %v2997_v20, %v363_v32  ;;  %v3088_v39 = vsub.f32 %v3000_v21, %v364_v33  ;;  %v425_v40 = vsel %vm303_vm0, %v393_v34, 0.0  ;;  %v428_v43 = vsel %vm303_vm0, %v394_v35, 0.0  ;;  %3921 = vst [vmem:[#allocation11_spill] sm:$0xff] %v3145_v30 }
  0xb9   : > { %423 = vadd.xlane.f32.xlu1 %v422_v31  ;;  %426 = vadd.xlane.f32.xlu0 %v425_v40  ;;  %v342_v41 = vpop.xlane.xlu0 %341  ;;  %v345_v42 = vpop.xlane.xlu1 %344 }
  0xba   : > { %v365_v46 = vmul.f32 0.03125, %v342_v41  ;;  %v366_v47 = vmul.f32 0.03125, %v345_v42  ;;  %v395_v48 = vmul.f32 %v3085_v38, %v3085_v38  ;;  %v396_v49 = vmul.f32 %v3088_v39, %v3088_v39 }
  0xbc   : > { %v3097_v50 = vsub.f32 %v3007_v24, %v365_v46  ;;  %v3100_v51 = vsub.f32 %v3010_v25, %v366_v47  ;;  %v431_v52 = vsel %vm303_vm0, %v395_v48, 0.0  ;;  %v434_v57 = vsel %vm303_vm0, %v396_v49, 0.0 }
  0xbd   : > { %429 = vadd.xlane.f32.xlu1 %v428_v43  ;;  %432 = vadd.xlane.f32.xlu0 %v431_v52  ;;  %v348_v53 = vpop.xlane.xlu0 %347  ;;  %v351_v56 = vpop.xlane.xlu1 %350 }
  0xbe   : > { %v367_v58 = vmul.f32 0.03125, %v348_v53  ;;  %v368_v59 = vmul.f32 0.03125, %v351_v56  ;;  %v397_v60 = vmul.f32 %v3097_v50, %v3097_v50  ;;  %v398_v61 = vmul.f32 %v3100_v51, %v3100_v51 }
  0xc0   : > { %v3109_v62 = vsub.f32 %v3017_v28, %v367_v58  ;;  %v3112_v63 = vsub.f32 %v3020_v29, %v368_v59  ;;  %v437_v6 = vsel %vm303_vm0, %v397_v60, 0.0  ;;  %v440_v7 = vsel %vm303_vm0, %v398_v61, 0.0 }
  0xc1   : > { %435 = vadd.xlane.f32.xlu1 %v434_v57  ;;  %438 = vadd.xlane.f32.xlu0 %v437_v6 }
  0xc2   : > { %v399_v10 = vmul.f32 %v3109_v62, %v3109_v62  ;;  %v400_v11 = vmul.f32 %v3112_v63, %v3112_v63 }
  0xc4   : > { %v443_v14 = vsel %vm303_vm0, %v399_v10, 0.0  ;;  %v446_v15 = vsel %vm303_vm0, %v400_v11, 0.0 }
  0xc5   : > { %441 = vadd.xlane.f32.xlu1 %v440_v7  ;;  %444 = vadd.xlane.f32.xlu0 %v443_v14  ;;  %v3151_v14 = vld [vmem:[%s3890_s4 + $0x1] ss:$0 sm:$0xff] }
  0xc9   : > { %447 = vadd.xlane.f32.xlu1 %v446_v15 }
 0x136   : > { %v403_v31 = vpop.xlane.xlu0 %402 }
 0x137   : > { %v449_v32 = vmul.f32 0.03125, %v403_v31 }
 0x139   : > { %v465_v33 = vadd.f32 1e-05, %v449_v32 }
 0x13a   : > { %v406_v34 = vpop.xlane.xlu1 %405  ;;  %v409_v35 = vpop.xlane.xlu0 %408 }
 0x13b   : > { %2622 = vrsqrt.f32 %v465_v33  ;;  %v450_v40 = vmul.f32 0.03125, %v406_v34  ;;  %v451_v41 = vmul.f32 0.03125, %v409_v35 }
 0x13d   : > { %v466_v42 = vadd.f32 1e-05, %v450_v40  ;;  %v467_v43 = vadd.f32 1e-05, %v451_v41 }
 0x13e   : > { %v412_v46 = vpop.xlane.xlu1 %411  ;;  %v415_v47 = vpop.xlane.xlu0 %414 }
 0x13f   : > { %2624 = vrsqrt.f32 %v466_v42  ;;  %v452_v48 = vmul.f32 0.03125, %v412_v46  ;;  %v453_v49 = vmul.f32 0.03125, %v415_v47 }
 0x140   : > { %2626 = vrsqrt.f32 %v467_v43  ;;  %v3158_v43 = vld [vmem:[%s3890_s4 + $0x2] ss:$0 sm:$0xff] }
 0x141   : > { %v468_v52 = vadd.f32 1e-05, %v452_v48  ;;  %v469_v53 = vadd.f32 1e-05, %v453_v49 }
 0x142   : > { %v418_v56 = vpop.xlane.xlu1 %417  ;;  %v421_v57 = vpop.xlane.xlu0 %420 }
 0x143   : > { %2628 = vrsqrt.f32 %v468_v52  ;;  %v454_v58 = vmul.f32 0.03125, %v418_v56  ;;  %v455_v59 = vmul.f32 0.03125, %v421_v57 }
 0x144   : > { %2630 = vrsqrt.f32 %v469_v53 }
 0x145   : > { %v2623_v60 = vpop.eup %2622  ;;  %v470_v61 = vadd.f32 1e-05, %v454_v58  ;;  %v471_v6 = vadd.f32 1e-05, %v455_v59 }
 0x146   : > { %v497_v7 = vmul.f32 %v2623_v60, %v3027_v36  ;;  %v424_v10 = vpop.xlane.xlu1 %423  ;;  %v427_v11 = vpop.xlane.xlu0 %426 }
 0x147   : > { %2632 = vrsqrt.f32 %v470_v61  ;;  %v456_v15 = vmul.f32 0.03125, %v424_v10  ;;  %v457_v31 = vmul.f32 0.03125, %v427_v11 }
 0x148   : > { %2634 = vrsqrt.f32 %v471_v6  ;;  %v517_v40 = vmul.f32 %v3151_v14, %v497_v7 }
 0x149   : > { %v2625_v32 = vpop.eup %2624  ;;  %v472_v33 = vadd.f32 1e-05, %v456_v15  ;;  %v473_v34 = vadd.f32 1e-05, %v457_v31 }
 0x14a   : > { %v2627_v35 = vpop.eup %2626  ;;  %v498_v41 = vmul.f32 %v2625_v32, %v3037_v44  ;;  %v430_v36 = vpop.xlane.xlu1 %429  ;;  %v537_v44 = vadd.f32 %v3158_v43, %v517_v40 }
 0x14b   : > { %v433_v42 = vpop.xlane.xlu0 %432  ;;  %v499_v46 = vmul.f32 %v2627_v35, %v3030_v37  ;;  %2636 = vrsqrt.f32 %v472_v33  ;;  %v458_v47 = vmul.f32 0.03125, %v430_v36 }
 0x14c   : > { %v459_v48 = vmul.f32 0.03125, %v433_v42  ;;  %v518_v49 = vmul.f32 %v3151_v14, %v498_v41  ;;  %2638 = vrsqrt.f32 %v473_v34 }
 0x14d   : > { %v2629_v52 = vpop.eup %2628  ;;  %v474_v53 = vadd.f32 1e-05, %v458_v47  ;;  %v519_v59 = vmul.f32 %v3151_v14, %v499_v46 }
 0x14e   : > { %v475_v56 = vadd.f32 1e-05, %v459_v48  ;;  %v2631_v57 = vpop.eup %2630  ;;  %v538_v58 = vadd.f32 %v3158_v43, %v518_v49  ;;  %v500_v60 = vmul.f32 %v2629_v52, %v3040_v45  ;;  %v436_v61 = vpop.xlane.xlu1 %435 }
 0x14f   : > { %v439_v37 = vpop.xlane.xlu0 %438  ;;  %v501_v6 = vmul.f32 %v2631_v57, %v3049_v54  ;;  %2640 = vrsqrt.f32 %v474_v53  ;;  %v460_v7 = vmul.f32 0.03125, %v436_v61  ;;  %v539_v35 = vadd.f32 %v3158_v43, %v519_v59 }
 0x150   : > { %v3167_v10 = vpack.c.bf16 %v538_v58, %v537_v44  ;;  %v520_v11 = vmul.f32 %v3151_v14, %v500_v60  ;;  %2642 = vrsqrt.f32 %v475_v56  ;;  %v461_v15 = vmul.f32 0.03125, %v439_v37 }
 0x151   : > { %v2633_v31 = vpop.eup %2632  ;;  %v521_v32 = vmul.f32 %v3151_v14, %v501_v6  ;;  %v476_v33 = vadd.f32 1e-05, %v460_v7 }
 0x152   : > { %3922 = vst [vmem:[#allocation12_spill] sm:$0xff] %v3167_v10  ;;  %v2635_v34 = vpop.eup %2634  ;;  %v540_v45 = vadd.f32 %v3158_v43, %v520_v11  ;;  %v502_v40 = vmul.f32 %v2633_v31, %v3052_v55  ;;  %v477_v54 = vadd.f32 1e-05, %v461_v15  ;;  %v442_v41 = vpop.xlane.xlu1 %441 }
 0x153   : > { %v445_v36 = vpop.xlane.xlu0 %444  ;;  %v503_v42 = vmul.f32 %v2635_v34, %v3061_v3  ;;  %2644 = vrsqrt.f32 %v476_v33  ;;  %v462_v46 = vmul.f32 0.03125, %v442_v41  ;;  %v541_v53 = vadd.f32 %v3158_v43, %v521_v32 }
 0x154   : > { %v3175_v47 = vpack.c.bf16 %v540_v45, %v539_v35  ;;  %v522_v48 = vmul.f32 %v3151_v14, %v502_v40  ;;  %2646 = vrsqrt.f32 %v477_v54  ;;  %v463_v49 = vmul.f32 0.03125, %v445_v36 }
 0x155   : > { %v2637_v52 = vpop.eup %2636  ;;  %v478_v56 = vadd.f32 1e-05, %v462_v46  ;;  %v523_v44 = vmul.f32 %v3151_v14, %v503_v42 }
 0x156   : > { %3923 = vst [vmem:[#allocation13_spill] sm:$0xff] %v3175_v47  ;;  %v2639_v57 = vpop.eup %2638  ;;  %v542_v55 = vadd.f32 %v3158_v43, %v522_v48  ;;  %v504_v58 = vmul.f32 %v2637_v52, %v3064_v4  ;;  %v479_v3 = vadd.f32 1e-05, %v463_v49  ;;  %v448_v59 = vpop.xlane.xlu1 %447 }
 0x157   : > { %v505_v60 = vmul.f32 %v2639_v57, %v3073_v22  ;;  %2648 = vrsqrt.f32 %v478_v56  ;;  %v464_v61 = vmul.f32 0.03125, %v448_v59  ;;  %v543_v31 = vadd.f32 %v3158_v43, %v523_v44 }
 0x158   : > { %v3183_v37 = vpack.c.bf16 %v542_v55, %v541_v53  ;;  %v524_v6 = vmul.f32 %v3151_v14, %v504_v58  ;;  %2650 = vrsqrt.f32 %v479_v3 }
 0x159   : > { %v2641_v7 = vpop.eup %2640  ;;  %v480_v11 = vadd.f32 1e-05, %v464_v61  ;;  %v525_v4 = vmul.f32 %v3151_v14, %v505_v60 }
 0x15a   : > { %3924 = vst [vmem:[#allocation14_spill] sm:$0xff] %v3183_v37  ;;  %v2643_v15 = vpop.eup %2642  ;;  %v544_v32 = vadd.f32 %v3158_v43, %v524_v6  ;;  %v506_v33 = vmul.f32 %v2641_v7, %v3076_v23 }
 0x15b   : > { %v507_v22 = vmul.f32 %v2643_v15, %v3085_v38  ;;  %2652 = vrsqrt.f32 %v480_v11  ;;  %v545_v54 = vadd.f32 %v3158_v43, %v525_v4  ;;  %v3221_v11 = vmov 0.0  }
 0x15c   : > { %v3191_v34 = vpack.c.bf16 %v544_v32, %v543_v31  ;;  %v526_v35 = vmul.f32 %v3151_v14, %v506_v33  ;;  %v3223_v15 = vmov 0.0   ;;  %v3225_v31 = vmov 0.0  }
 0x15d   : > { %v2645_v45 = vpop.eup %2644  ;;  %v527_v36 = vmul.f32 %v3151_v14, %v507_v22  ;;  %v3227_v32 = vmov 0.0   ;;  %v3229_v4 = vmov 0.0   ;;  %v3233_v33 = vmov 0.0  }
 0x15e   : > { %3925 = vst [vmem:[#allocation15_spill] sm:$0xff] %v3191_v34  ;;  %v2647_v40 = vpop.eup %2646  ;;  %v546_v41 = vadd.f32 %v3158_v43, %v526_v35  ;;  %v508_v42 = vmul.f32 %v2645_v45, %v3088_v39  ;;  %v3237_v22 = vmov 0.0   ;;  %v3241_v35 = vmov 0.0  }
 0x15f   : > { %v509_v46 = vmul.f32 %v2647_v40, %v3097_v50  ;;  %v547_v52 = vadd.f32 %v3158_v43, %v527_v36  ;;  %v3243_v45 = vmov 0.0   ;;  %v3245_v40 = vmov 0.0  }
 0x160   : > { %v3199_v23 = vpack.c.bf16 %v546_v41, %v545_v54  ;;  %v528_v38 = vmul.f32 %v3151_v14, %v508_v42  ;;  %v3247_v54 = vmov 0.0   ;;  %v3249_v41 = vmov 0.0  }
 0x161   : > { %v2649_v48 = vpop.eup %2648  ;;  %v529_v56 = vmul.f32 %v3151_v14, %v509_v46  ;;  %v3251_v36 = vmov 0.0  }
 0x162   : > { %3926 = vst [vmem:[#allocation16_spill] sm:$0xff] %v3199_v23  ;;  %v2651_v49 = vpop.eup %2650  ;;  %v548_v53 = vadd.f32 %v3158_v43, %v528_v38  ;;  %v510_v57 = vmul.f32 %v2649_v48, %v3100_v51 }
 0x163   : > { %v511_v55 = vmul.f32 %v2651_v49, %v3109_v62  ;;  %v549_v58 = vadd.f32 %v3158_v43, %v529_v56 }
 0x164   : > { %v3207_v44 = vpack.c.bf16 %v548_v53, %v547_v52  ;;  %v530_v39 = vmul.f32 %v3151_v14, %v510_v57 }
 0x165   : > { %v2653_v50 = vpop.eup %2652  ;;  %v531_v59 = vmul.f32 %v3151_v14, %v511_v55 }
 0x166   : > { %3927 = vst [vmem:[#allocation17_spill] sm:$0xff] %v3207_v44  ;;  %v550_v3 = vadd.f32 %v3158_v43, %v530_v39  ;;  %v512_v60 = vmul.f32 %v2653_v50, %v3112_v63  ;;  %v3231_v63 = vmov 0.0  }
 0x167   : > { %v551_v51 = vadd.f32 %v3158_v43, %v531_v59 }
 0x168   : > { %v3214_v61 = vpack.c.bf16 %v550_v3, %v549_v58  ;;  %v532_v6 = vmul.f32 %v3151_v14, %v512_v60  ;;  %v3235_v14 = vmov 0.0  }
 0x16a   : > { %3928 = vst [vmem:[#allocation18_spill] sm:$0xff] %v3214_v61  ;;  %v552_v62 = vadd.f32 %v3158_v43, %v532_v6  ;;  %v3239_v43 = vmov 0.0  }
 0x16c   : > { %v3219_v7 = vpack.c.bf16 %v552_v62, %v551_v51 }
 0x16e   : > { %3929 = vst [vmem:[#allocation19_spill] sm:$0xff] %v3219_v7 }
 0x16f LB: >> { %v3931_v47 = vld [vmem:[#allocation13_spill] sm:$0xff]  ;;  %v3933_v37 = vld [vmem:[#allocation14_spill] sm:$0xff]  ;;  %v3934_v34 = vld [vmem:[#allocation15_spill] sm:$0xff]  ;;  %s3311_s26 = sshll.u32 %s2886_s25, 4  ;;  %s566_s25 = sadd.s32 1, %s2886_s25   ;;  %v2850_v14 = vphi %v3235_v14, %v3960_v14   ;;  %v2846_v33 = vphi %v3233_v33, %v3959_v33   ;;  %v2842_v63 = vphi %v3231_v63, %v3958_v63   ;;  %v2838_v4 = vphi %v3229_v4, %v3957_v4   ;;  %v2834_v32 = vphi %v3227_v32, %v3956_v32   ;;  %v2830_v31 = vphi %v3225_v31, %v3955_v31   ;;  %v2826_v15 = vphi %v3223_v15, %v3954_v15   ;;  %v2822_v11 = vphi %v3221_v11, %v3953_v11   ;;  %s2886_s25 = sphi %s3253_s25, %s566_s25   ;;  %v2882_v36 = vphi %v3251_v36, %v3968_v36   ;;  %v2878_v41 = vphi %v3249_v41, %v3967_v41   ;;  %v2874_v54 = vphi %v3247_v54, %v3966_v54   ;;  %v2870_v40 = vphi %v3245_v40, %v3965_v40   ;;  %v2866_v45 = vphi %v3243_v45, %v3964_v45   ;;  %v2862_v35 = vphi %v3241_v35, %v3963_v35   ;;  %v2858_v43 = vphi %v3239_v43, %v3962_v43   ;;  %v2854_v22 = vphi %v3237_v22, %v3961_v22  }
 0x170   : >> { %v3932_v44 = vld [vmem:[#allocation17_spill] sm:$0xff]  ;;  %v3935_v23 = vld [vmem:[#allocation16_spill] sm:$0xff]  ;;  %s724_s29 = scalar_lea.vmem %s3888_s2, %s3311_s26  ;;  %s585_s10 = scalar_lea.vmem %s3887_s1, %s3311_s26 }
 0x171   : >> { %v3930_v61 = vld [vmem:[#allocation18_spill] sm:$0xff]  ;;  %v3936_v10 = vld [vmem:[#allocation12_spill] sm:$0xff]  ;;  %v2655_v46 = vld [vmem:[%s724_s29 + $0x8] sm:$0xff]   ;;  %s839_s13 = scalar_lea.vmem %s3889_s3, %s3311_s26  ;;  %p3469_p4 = scmp.ge.s32.totalorder %s566_s25, 4  }
 0x172   : >> { %2330 = vmatprep.mubr.msk.bf16.mxu1 %vm303_vm0, %v3936_v10  ;;  %2310 = vmatprep.mubr.msk.bf16.mxu0 %vm303_vm0, %v3936_v10  ;;  %v2654_v42 = vld [vmem:[%s724_s29] sm:$0xff]   ;;  %v2657_v48 = vld [vmem:[%s585_s10 + $0x8] sm:$0xff]  }
 0x173   : >> { %2326 = vmatprep.subr.bf16.mxu1 %v2654_v42  ;;  %v2656_v38 = vld [vmem:[%s585_s10] sm:$0xff]   ;;  %v2659_v52 = vld [vmem:[%s839_s13 + $0x8] sm:$0xff]  }
 0x174   : >> { %2327 = vmatpush3.bf16.msra.mxu1 %v2654_v42  ;;  %2306 = vmatprep.subr.bf16.mxu0 %v2656_v38  ;;  %v2658_v49 = vld [vmem:[%s839_s13] sm:$0xff]  }
 0x175   : >> { %v3937_v7 = vld [vmem:[#allocation19_spill] sm:$0xff]  ;;  %2328 = vmatprep.subr.bf16.mxu1 %v2655_v46  ;;  %2307 = vmatpush3.bf16.msra.mxu0 %v2656_v38 }
 0x176   : >> { %2308 = vmatprep.subr.bf16.mxu0 %v2657_v48 }
 0x178   : >> { %2329 = vmatpush3.bf16.msra.mxu1 %v2655_v46 }
 0x179   : >> { %2309 = vmatpush3.bf16.msra.mxu0 %v2657_v48 }
 0x17a   : >> { %2346 = vmatprep.subr.bf16.mxu0 %v2658_v49 }
 0x17b   : >> { %2331 = vmatmul.mubr.msk.bf16.vlgmr.msra.gmra.mrb[0].mxu1 %vm303_vm0, %v3931_v47 }
 0x17c   : >> { %2334 = vmatprep.mubr.msk.bf16.mxu1 %vm303_vm0, %v3933_v37  ;;  %2311 = vmatmul.mubr.msk.bf16.vlgmr.msra.gmra.mrb[0].mxu0 %vm303_vm0, %v3931_v47 }
 0x17d   : >> { %2314 = vmatprep.mubr.msk.bf16.mxu0 %vm303_vm0, %v3933_v37  ;;  %2347 = vmatpush3.bf16.msra.mxu0 %v2658_v49 }
 0x17e   : >> { %2348 = vmatprep.subr.bf16.mxu0 %v2659_v52 }
 0x181   : >> { %2349 = vmatpush3.bf16.msra.mxu0 %v2659_v52 }
 0x183   : >> { %2335 = vmatmul.mubr.msk.bf16.gmra.mrb[4].mxu1 %vm303_vm0, %v3934_v34 }
 0x184   : >> { %2338 = vmatprep.mubr.msk.bf16.mxu1 %vm303_vm0, %v3935_v23  ;;  %2315 = vmatmul.mubr.msk.bf16.gmra.mrb[4].mxu0 %vm303_vm0, %v3934_v34 }
 0x185   : >> { %2318 = vmatprep.mubr.msk.bf16.mxu0 %vm303_vm0, %v3935_v23 }
 0x18b   : >> { %2339 = vmatmul.mubr.msk.bf16.gmra.mrb[8].mxu1 %vm303_vm0, %v3932_v44 }
 0x18c   : >> { %2342 = vmatprep.mubr.msk.bf16.mxu1 %vm303_vm0, %v3930_v61  ;;  %2319 = vmatmul.mubr.msk.bf16.gmra.mrb[8].mxu0 %vm303_vm0, %v3932_v44 }
 0x18d   : >> { %2322 = vmatprep.mubr.msk.bf16.mxu0 %vm303_vm0, %v3930_v61 }
 0x193   : >> { %2343 = vmatmul.mubr.msk.bf16.gmra.mrb[12].mxu1 %vm303_vm0, %v3937_v7 }
 0x194   : >> { %2323 = vmatmul.mubr.msk.bf16.gmra.mrb[12].mxu0 %vm303_vm0, %v3937_v7 }
 0x195   : >> { %2350 = vmatprep.mubr.msk.bf16.mxu0 %vm303_vm0, %v3936_v10 }
 0x19c   : >> { %2351 = vmatmul.mubr.msk.bf16.vlgmr.msra.gmra.mrb[16].mxu0 %vm303_vm0, %v3931_v47 }
 0x19d   : >> { %2354 = vmatprep.mubr.msk.bf16.mxu0 %vm303_vm0, %v3933_v37 }
 0x1a4   : >> { %2355 = vmatmul.mubr.msk.bf16.gmra.mrb[20].mxu0 %vm303_vm0, %v3934_v34 }
 0x1a5   : >> { %2358 = vmatprep.mubr.msk.bf16.mxu0 %vm303_vm0, %v3935_v23 }
 0x1ac   : >> { %2359 = vmatmul.mubr.msk.bf16.gmra.mrb[24].mxu0 %vm303_vm0, %v3932_v44 }
 0x1ad   : >> { %2362 = vmatprep.mubr.msk.bf16.mxu0 %vm303_vm0, %v3930_v61 }
 0x1b4   : >> { %2363 = vmatmul.mubr.msk.bf16.gmra.mrb[28].mxu0 %vm303_vm0, %v3937_v7 }
 0x24e   : >> { %v2332_v53 = vpop.f32.mrb[0].mxu1 }
 0x24f   : >> { %v775_v56 = vpop.f32.mrb[1].mxu1  ;;  %v3369_v55 = vpop.f32.mrb[0].mxu0 }
 0x250   : >> { %v2333_v57 = vpop.f32.mrb[2].mxu1  ;;  %v660_v58 = vpop.f32.mrb[1].mxu0 }
 0x251   : >> { %v962_v39 = vpack.c.bf16 %v2333_v57, %v2332_v53  ;;  %v778_v50 = vpop.f32.mrb[3].mxu1  ;;  %v3371_v59 = vpop.f32.mrb[2].mxu0 }
 0x252   : >> { %v961_v3 = vpack.c.bf16 %v778_v50, %v775_v56  ;;  %v663_v6 = vpop.f32.mrb[3].mxu0 }
 0x253   : >> { %v953_v62 = vpack.c.bf16 %v663_v6, %v660_v58  ;;  %v997_v7 = vsel %vm303_vm0, %v962_v39, 0 }
 0x254   : >> { %v994_v51 = vsel %vm303_vm0, %v961_v3, 0  ;;  %2470 = vmatprep.subr.msk.bf16.mxu1 %vm303_vm0, %v961_v3 }
 0x255   : >> { %2367 = vmatpush3.bf16.xpose.msra.mxu1 %v994_v51  ;;  %2382 = vmatprep.mubr.msk.bf16.mxu1 %vm303_vm0, %v953_v62 }
 0x256   : >> { %2471 = vmatprep.subr.msk.bf16.mxu1 %vm303_vm0, %v962_v39  ;;  %v2336_v42 = vpop.f32.mrb[4].mxu1 }
 0x257   : >> { %v791_v46 = vpop.f32.mrb[5].mxu1  ;;  %v2316_v48 = vpop.f32.mrb[4].mxu0 }
 0x258   : >> { %v2337_v38 = vpop.f32.mrb[6].mxu1  ;;  %v676_v53 = vpop.f32.mrb[5].mxu0 }
 0x259   : >> { %v964_v49 = vpack.c.bf16 %v2337_v38, %v2336_v42  ;;  %v794_v52 = vpop.f32.mrb[7].mxu1  ;;  %v2317_v57 = vpop.f32.mrb[6].mxu0 }
 0x25a   : >> { %v963_v56 = vpack.c.bf16 %v794_v52, %v791_v46  ;;  %v956_v50 = vpack.c.bf16 %v2317_v57, %v2316_v48  ;;  %v679_v60 = vpop.f32.mrb[7].mxu0 }
 0x25b   : >> { %v955_v3 = vpack.c.bf16 %v679_v60, %v676_v53 }
 0x25c   : >> { %v1000_v48 = vsel %vm303_vm0, %v963_v56, 0 }
 0x25d   : >> { %2369 = vmatpush3.bf16.xpose.msra.mxu1 %v997_v7 }
 0x25e   : >> { %2472 = vmatprep.subr.msk.bf16.mxu1 %vm303_vm0, %v963_v56  ;;  %v2340_v58 = vpop.f32.mrb[8].mxu1 }
 0x25f   : >> { %v807_v6 = vpop.f32.mrb[9].mxu1  ;;  %v2320_v62 = vpop.f32.mrb[8].mxu0 }
 0x260   : >> { %v2341_v51 = vpop.f32.mrb[10].mxu1  ;;  %v692_v34 = vpop.f32.mrb[9].mxu0 }
 0x261   : >> { %v966_v10 = vpack.c.bf16 %v2341_v51, %v2340_v58  ;;  %v810_v23 = vpop.f32.mrb[11].mxu1  ;;  %v2321_v38 = vpop.f32.mrb[10].mxu0 }
 0x262   : >> { %v965_v42 = vpack.c.bf16 %v810_v23, %v807_v6  ;;  %v958_v37 = vpack.c.bf16 %v2321_v38, %v2320_v62  ;;  %v695_v46 = vpop.f32.mrb[11].mxu0  ;;  %v1003_v6 = vsel %vm303_vm0, %v964_v49, 0 }
 0x263   : >> { %v957_v52 = vpack.c.bf16 %v695_v46, %v692_v34  ;;  %v1009_v56 = vsel %vm303_vm0, %v966_v10, 0 }
 0x264   : >> { %v1006_v34 = vsel %vm303_vm0, %v965_v42, 0 }
 0x265   : >> { %2371 = vmatpush3.bf16.xpose.msra.mxu1 %v1000_v48 }
 0x266   : >> { %2473 = vmatprep.subr.msk.bf16.mxu1 %vm303_vm0, %v964_v49  ;;  %v2344_v7 = vpop.f32.mrb[12].mxu1  ;;  %v3938_v49 = vpack.c.bf16 %v3371_v59, %v3369_v55 }
 0x267   : >> { %v823_v39 = vpop.f32.mrb[13].mxu1  ;;  %v2324_v53 = vpop.f32.mrb[12].mxu0 }
 0x268   : >> { %v2345_v60 = vpop.f32.mrb[14].mxu1  ;;  %v708_v47 = vpop.f32.mrb[13].mxu0 }
 0x269   : >> { %v968_v57 = vpack.c.bf16 %v2345_v60, %v2344_v7  ;;  %v826_v44 = vpop.f32.mrb[15].mxu1  ;;  %v2325_v51 = vpop.f32.mrb[14].mxu0 }
 0x26a   : >> { %v967_v58 = vpack.c.bf16 %v826_v44, %v823_v39  ;;  %v960_v61 = vpack.c.bf16 %v2325_v51, %v2324_v53  ;;  %v711_v23 = vpop.f32.mrb[15].mxu0 }
 0x26b   : >> { %v959_v62 = vpack.c.bf16 %v711_v23, %v708_v47  ;;  %v1015_v47 = vsel %vm303_vm0, %v968_v57, 0 }
 0x26c   : >> { %v1012_v44 = vsel %vm303_vm0, %v967_v58, 0 }
 0x26d   : >> { %2373 = vmatpush3.bf16.xpose.msra.mxu1 %v1003_v6 }
 0x26e   : >> { %2474 = vmatprep.subr.msk.bf16.mxu1 %vm303_vm0, %v965_v42 }
 0x275   : >> { %2375 = vmatpush3.bf16.xpose.msra.mxu1 %v1006_v34 }
 0x276   : >> { %2475 = vmatprep.subr.msk.bf16.mxu1 %vm303_vm0, %v966_v10  ;;  %v2352_v10 = vpop.f32.mrb[16].mxu0 }
 0x277   : >> { %v890_v42 = vpop.f32.mrb[17].mxu0 }
 0x278   : >> { %v2353_v38 = vpop.f32.mrb[18].mxu0 }
 0x279   : >> { %v1243_v46 = vpack.c.bf16 %v2353_v38, %v2352_v10  ;;  %v893_v48 = vpop.f32.mrb[19].mxu0 }
 0x27a   : >> { %v1242_v55 = vpack.c.bf16 %v893_v48, %v890_v42  ;;  %v2356_v59 = vpop.f32.mrb[20].mxu0 }
 0x27c   : >> { %2398 = vmatprep.subr.bf16.mxu0 %v1242_v55 }
 0x27d   : >> { %2377 = vmatpush3.bf16.xpose.msra.mxu1 %v1009_v56  ;;  %2399 = vmatpush3.bf16.msra.mxu0 %v1242_v55 }
 0x27e   : >> { %2476 = vmatprep.subr.msk.bf16.mxu1 %vm303_vm0, %v967_v58  ;;  %2400 = vmatprep.subr.bf16.mxu0 %v1243_v46 }
 0x281   : >> { %2401 = vmatpush3.bf16.msra.mxu0 %v1243_v46 }
 0x285   : >> { %2379 = vmatpush3.bf16.xpose.msra.mxu1 %v1012_v44 }
 0x286   : >> { %2477 = vmatprep.subr.msk.bf16.mxu1 %vm303_vm0, %v968_v57 }
 0x28d   : >> { %2381 = vmatpush3.bf16.xpose.msra.mxu1 %v1015_v47 }
 0x294   : >> { %2383 = vmatmul.mubr.msk.bf16.vlgmr.msra.gmra.mrb[16].mxu1 %vm303_vm0, %v3938_v49 }
 0x295   : >> { %2386 = vmatprep.mubr.msk.bf16.mxu1 %vm303_vm0, %v955_v3  ;;  %v906_v3 = vpop.f32.mrb[21].mxu0 }
 0x29c   : >> { %2387 = vmatmul.mubr.msk.bf16.gmra.mrb[20].mxu1 %vm303_vm0, %v956_v50  ;;  %v2357_v50 = vpop.f32.mrb[22].mxu0 }
 0x29d   : >> { %2390 = vmatprep.mubr.msk.bf16.mxu1 %vm303_vm0, %v957_v52  ;;  %v1245_v7 = vpack.c.bf16 %v2357_v50, %v2356_v59  ;;  %v909_v52 = vpop.f32.mrb[23].mxu0 }
 0x29e   : >> { %v2360_v39 = vpop.f32.mrb[24].mxu0 }
 0x2a4   : >> { %2391 = vmatmul.mubr.msk.bf16.gmra.mrb[24].mxu1 %vm303_vm0, %v958_v37  ;;  %v1244_v37 = vpack.c.bf16 %v909_v52, %v906_v3 }
 0x2a5   : >> { %2394 = vmatprep.mubr.msk.bf16.mxu1 %vm303_vm0, %v959_v62 }
 0x2a6   : >> { %2402 = vmatprep.subr.bf16.mxu0 %v1244_v37 }
 0x2a7   : >> { %2403 = vmatpush3.bf16.msra.mxu0 %v1244_v37 }
 0x2a8   : >> { %2404 = vmatprep.subr.bf16.mxu0 %v1245_v7 }
 0x2ab   : >> { %2405 = vmatpush3.bf16.msra.mxu0 %v1245_v7 }
 0x2ac   : >> { %2395 = vmatmul.mubr.msk.bf16.gmra.mrb[28].mxu1 %vm303_vm0, %v960_v61  ;;  %v922_v61 = vpop.f32.mrb[25].mxu0 }
 0x2ad   : >> { %v2361_v60 = vpop.f32.mrb[26].mxu0 }
 0x2ae   : >> { %v1247_v53 = vpack.c.bf16 %v2361_v60, %v2360_v39  ;;  %v925_v57 = vpop.f32.mrb[27].mxu0 }
 0x2af   : >> { %v1246_v58 = vpack.c.bf16 %v925_v57, %v922_v61  ;;  %v2364_v10 = vpop.f32.mrb[28].mxu0 }
 0x2b0   : >> { %v938_v48 = vpop.f32.mrb[29].mxu0 }
 0x2b1   : >> { %2406 = vmatprep.subr.bf16.mxu0 %v1246_v58  ;;  %v2365_v55 = vpop.f32.mrb[30].mxu0 }
 0x2b2   : >> { %2407 = vmatpush3.bf16.msra.mxu0 %v1246_v58  ;;  %v941_v59 = vpop.f32.mrb[31].mxu0  ;;  %v1249_v37 = vpack.c.bf16 %v2365_v55, %v2364_v10 }
 0x2b3   : >> { %2408 = vmatprep.subr.bf16.mxu0 %v1247_v53  ;;  %v1248_v3 = vpack.c.bf16 %v941_v59, %v938_v48 }
 0x2b6   : >> { %2409 = vmatpush3.bf16.msra.mxu0 %v1247_v53 }
 0x2b7   : >> { %2410 = vmatprep.subr.bf16.mxu0 %v1248_v3 }
 0x2ba   : >> { %2411 = vmatpush3.bf16.msra.mxu0 %v1248_v3 }
 0x2bb   : >> { %2412 = vmatprep.subr.bf16.mxu0 %v1249_v37 }
 0x2be   : >> { %2413 = vmatpush3.bf16.msra.mxu0 %v1249_v37 }
 0x367   : >> { %v2384_v51 = vpop.f32.mrb[16].mxu1 }
 0x368   : >> { %1118 = vmax.xlane.f32.xlu1 %v2384_v51  ;;  %v1051_v23 = vpop.f32.mrb[17].mxu1 }
 0x369   : >> { %1114 = vmax.xlane.f32.xlu0 %v1051_v23  ;;  %v2385_v6 = vpop.f32.mrb[18].mxu1 }
 0x36a   : >> { %v1054_v62 = vpop.f32.mrb[19].mxu1 }
 0x36c   : >> { %1120 = vmax.xlane.f32.xlu1 %v2385_v6 }
 0x36d   : >> { %1116 = vmax.xlane.f32.xlu0 %v1054_v62 }
 0x36f   : >> { %v2388_v34 = vpop.f32.mrb[20].mxu1 }
 0x370   : >> { %v1067_v56 = vpop.f32.mrb[21].mxu1 }
 0x371   : >> { %1122 = vmax.xlane.f32.xlu0 %v1067_v56  ;;  %v2389_v44 = vpop.f32.mrb[22].mxu1 }
 0x372   : >> { %v1070_v47 = vpop.f32.mrb[23].mxu1 }
 0x373   : >> { %1124 = vmax.xlane.f32.xlu1 %v1070_v47 }
 0x375   : >> { %1126 = vmax.xlane.f32.xlu0 %v2388_v34 }
 0x377   : >> { %1128 = vmax.xlane.f32.xlu1 %v2389_v44  ;;  %v3402_v49 = vpop.f32.mrb[24].mxu1 }
 0x378   : >> { %v1083_v42 = vpop.f32.mrb[25].mxu1 }
 0x379   : >> { %1130 = vmax.xlane.f32.xlu0 %v1083_v42  ;;  %v3404_v38 = vpop.f32.mrb[26].mxu1 }
 0x37a   : >> { %v1086_v46 = vpop.f32.mrb[27].mxu1 }
 0x37b   : >> { %1132 = vmax.xlane.f32.xlu1 %v1086_v46 }
 0x37d   : >> { %1134 = vmax.xlane.f32.xlu0 %v3402_v49 }
 0x37f   : >> { %1136 = vmax.xlane.f32.xlu1 %v3404_v38  ;;  %v3408_v50 = vpop.f32.mrb[28].mxu1 }
 0x380   : >> { %v3410_v7 = vpop.f32.mrb[29].mxu1 }
 0x381   : >> { %1138 = vmax.xlane.f32.xlu0 %v3410_v7  ;;  %v3413_v52 = vpop.f32.mrb[30].mxu1 }
 0x382   : >> { %v3415_v39 = vpop.f32.mrb[31].mxu1 }
 0x383   : >> { %1140 = vmax.xlane.f32.xlu1 %v3415_v39 }
 0x385   : >> { %1142 = vmax.xlane.f32.xlu0 %v3408_v50 }
 0x387   : >> { %1144 = vmax.xlane.f32.xlu1 %v3413_v52 }
 0x3f5   : >> { %v1119_v61 = vpop.xlane.xlu1 %1118 }
 0x3f6   : >> { %v1115_v60 = vpop.xlane.xlu0 %1114  ;;  %v1148_v57 = vsub.f32 %v2384_v51, %v1119_v61 }
 0x3f7   : >> { %v1146_v59 = vsub.f32 %v1051_v23, %v1115_v60 }
 0x3f9   : >> { %v1121_v53 = vpop.xlane.xlu1 %1120 }
 0x3fa   : >> { %v1149_v58 = vsub.f32 %v2385_v6, %v1121_v53  ;;  %v1117_v48 = vpop.xlane.xlu0 %1116 }
 0x3fb   : >> { %v1147_v3 = vsub.f32 %v1054_v62, %v1117_v48 }
 0x3fc   : >> { %v1163_v30 = vpack.c.bf16 %v1149_v58, %v1148_v57 }
 0x3fd   : >> { %v1162_v10 = vpack.c.bf16 %v1147_v3, %v1146_v59 }
 0x3fe   : >> { %v1174_v55 = vmul.bf16 1069105081, %v1163_v30  ;;  %v1123_v27 = vpop.xlane.xlu0 %1122 }
 0x3ff   : >> { %v1171_v26 = vmul.bf16 1069105081, %v1162_v10  ;;  %v1150_v37 = vsub.f32 %v1067_v56, %v1123_v27 }
 0x400   : >> { %2660 = vpow.bf16 %v1174_v55  ;;  %v1125_v19 = vpop.xlane.xlu1 %1124 }
 0x401   : >> { %2662 = vpow.bf16 %v1171_v26  ;;  %v1151_v29 = vsub.f32 %v1070_v47, %v1125_v19 }
 0x402   : >> { %v1127_v28 = vpop.xlane.xlu0 %1126 }
 0x403   : >> { %v1164_v25 = vpack.c.bf16 %v1151_v29, %v1150_v37  ;;  %v1152_v20 = vsub.f32 %v2388_v34, %v1127_v28 }
 0x404   : >> { %v1129_v24 = vpop.xlane.xlu1 %1128 }
 0x405   : >> { %v1177_v21 = vmul.bf16 1069105081, %v1164_v25  ;;  %v1153_v51 = vsub.f32 %v2389_v44, %v1129_v24 }
 0x406   : >> { %v1131_v6 = vpop.xlane.xlu0 %1130 }
 0x407   : >> { %2664 = vpow.bf16 %v1177_v21  ;;  %v1165_v23 = vpack.c.bf16 %v1153_v51, %v1152_v20  ;;  %v1154_v60 = vsub.f32 %v1083_v42, %v1131_v6 }
 0x408   : >> { %v1133_v62 = vpop.xlane.xlu1 %1132 }
 0x409   : >> { %v1180_v61 = vmul.bf16 1069105081, %v1165_v23  ;;  %v1155_v30 = vsub.f32 %v1086_v46, %v1133_v62 }
 0x40a   : >> { %v1135_v53 = vpop.xlane.xlu0 %1134 }
 0x40b   : >> { %v2661_v57 = vpop.eup %2660  ;;  %2666 = vpow.bf16 %v1180_v61  ;;  %v1166_v58 = vpack.c.bf16 %v1155_v30, %v1154_v60  ;;  %v1156_v25 = vsub.f32 %v3402_v49, %v1135_v53 }
 0x40c   : >> { %v2663_v26 = vpop.eup %2662  ;;  %v1137_v27 = vpop.xlane.xlu1 %1136  ;;  %v1196_v19 = vunpack.c.l.bf16 %v2661_v57  ;;  %v1197_v56 = vunpack.c.h.bf16 %v2661_v57 }
 0x40d   : >> { %v1183_v29 = vmul.bf16 1069105081, %v1166_v58  ;;  %v1157_v24 = vsub.f32 %v3404_v38, %v1137_v27  ;;  %2414 = vmatprep.mubr.bf16.mxu0 %v2663_v26  ;;  %v1194_v34 = vunpack.c.l.bf16 %v2663_v26  ;;  %v1195_v44 = vunpack.c.h.bf16 %v2663_v26 }
 0x40e   : >> { %1214 = vadd.xlane.f32.xlu0 %v1196_v19  ;;  %v1139_v20 = vpop.xlane.xlu0 %1138  ;;  %1216 = vadd.xlane.f32.xlu1 %v1197_v56 }
 0x40f   : >> { %2668 = vpow.bf16 %v1183_v29  ;;  %v1167_v21 = vpack.c.bf16 %v1157_v24, %v1156_v25  ;;  %2415 = vmatmul.mubr.bf16.vlgmr.msra.gmra.mrb[32].mxu0 %v2661_v57  ;;  %v1158_v42 = vsub.f32 %v3410_v7, %v1139_v20 }
 0x410   : >> { %v1141_v28 = vpop.xlane.xlu1 %1140 }
 0x411   : >> { %v1186_v47 = vmul.bf16 1069105081, %v1167_v21  ;;  %v1159_v46 = vsub.f32 %v3415_v39, %v1141_v28 }
 0x412   : >> { %v2665_v48 = vpop.eup %2664  ;;  %1210 = vadd.xlane.f32.xlu0 %v1194_v34  ;;  %v1143_v49 = vpop.xlane.xlu0 %1142  ;;  %1212 = vadd.xlane.f32.xlu1 %v1195_v44 }
 0x413   : >> { %2670 = vpow.bf16 %v1186_v47  ;;  %v1168_v38 = vpack.c.bf16 %v1159_v46, %v1158_v42  ;;  %2418 = vmatprep.mubr.bf16.mxu0 %v2665_v48  ;;  %v1160_v10 = vsub.f32 %v3408_v50, %v1143_v49  ;;  %v1198_v62 = vunpack.c.l.bf16 %v2665_v48 }
 0x414   : >> { %v1145_v59 = vpop.xlane.xlu1 %1144  ;;  %v1199_v61 = vunpack.c.h.bf16 %v2665_v48 }
 0x415   : >> { %v1189_v3 = vmul.bf16 1069105081, %v1168_v38  ;;  %v1161_v55 = vsub.f32 %v3413_v52, %v1145_v59 }
 0x416   : >> { %v2667_v37 = vpop.eup %2666 }
 0x417   : >> { %2672 = vpow.bf16 %v1189_v3  ;;  %v1169_v51 = vpack.c.bf16 %v1161_v55, %v1160_v10  ;;  %2419 = vmatmul.mubr.bf16.gmra.mrb[36].mxu0 %v2667_v37  ;;  %v1200_v7 = vunpack.c.l.bf16 %v2667_v37  ;;  %v1201_v6 = vunpack.c.h.bf16 %v2667_v37 }
 0x419   : >> { %v1192_v39 = vmul.bf16 1069105081, %v1169_v51  ;;  %1222 = vadd.xlane.f32.xlu0 %v1200_v7  ;;  %1224 = vadd.xlane.f32.xlu1 %v1201_v6 }
 0x41a   : >> { %v2669_v23 = vpop.eup %2668 }
 0x41b   : >> { %2674 = vpow.bf16 %v1192_v39  ;;  %2422 = vmatprep.mubr.bf16.mxu0 %v2669_v23  ;;  %v1202_v53 = vunpack.c.l.bf16 %v2669_v23  ;;  %v1203_v57 = vunpack.c.h.bf16 %v2669_v23 }
 0x41d   : >> { %1218 = vadd.xlane.f32.xlu0 %v1198_v62  ;;  %1220 = vadd.xlane.f32.xlu1 %v1199_v61 }
 0x41e   : >> { %v2671_v60 = vpop.eup %2670 }
 0x41f   : >> { %2423 = vmatmul.mubr.bf16.gmra.mrb[40].mxu0 %v2671_v60  ;;  %v1204_v50 = vunpack.c.l.bf16 %v2671_v60  ;;  %v1205_v52 = vunpack.c.h.bf16 %v2671_v60 }
 0x421   : >> { %1230 = vadd.xlane.f32.xlu0 %v1204_v50  ;;  %1232 = vadd.xlane.f32.xlu1 %v1205_v52 }
 0x422   : >> { %v2673_v30 = vpop.eup %2672 }
 0x423   : >> { %2426 = vmatprep.mubr.bf16.mxu0 %v2673_v30  ;;  %v1207_v26 = vunpack.c.h.bf16 %v2673_v30  ;;  %v1206_v27 = vunpack.c.l.bf16 %v2673_v30 }
 0x425   : >> { %1226 = vadd.xlane.f32.xlu0 %v1202_v53  ;;  %1228 = vadd.xlane.f32.xlu1 %v1203_v57 }
 0x426   : >> { %v2675_v58 = vpop.eup %2674 }
 0x427   : >> { %2427 = vmatmul.mubr.bf16.gmra.mrb[44].mxu0 %v2675_v58  ;;  %v1209_v19 = vunpack.c.h.bf16 %v2675_v58  ;;  %v1208_v56 = vunpack.c.l.bf16 %v2675_v58 }
 0x429   : >> { %1236 = vadd.xlane.f32.xlu1 %v1207_v26  ;;  %1234 = vadd.xlane.f32.xlu0 %v1206_v27 }
 0x42d   : >> { %1240 = vadd.xlane.f32.xlu1 %v1209_v19  ;;  %1238 = vadd.xlane.f32.xlu0 %v1208_v56 }
 0x49b   : >> { %v1215_v29 = vpop.xlane.xlu0 %1214  ;;  %v1217_v25 = vpop.xlane.xlu1 %1216 }
 0x49c   : >> { %2676 = vrcp.f32 %v1215_v29 }
 0x49f   : >> { %v1211_v24 = vpop.xlane.xlu0 %1210  ;;  %v1213_v20 = vpop.xlane.xlu1 %1212 }
 0x4a0   : >> { %2678 = vrcp.f32 %v1211_v24 }
 0x4a1   : >> { %2680 = vrcp.f32 %v1217_v25 }
 0x4a2   : >> { %2682 = vrcp.f32 %v1213_v20 }
 0x4a6   : >> { %v1223_v21 = vpop.xlane.xlu0 %1222  ;;  %v1225_v28 = vpop.xlane.xlu1 %1224 }
 0x4a7   : >> { %2684 = vrcp.f32 %v1223_v21  ;;  %v2677_v48 = vpop.eup %2676 }
 0x4aa   : >> { %v1219_v34 = vpop.xlane.xlu0 %1218  ;;  %v1221_v44 = vpop.xlane.xlu1 %1220 }
 0x4ab   : >> { %2686 = vrcp.f32 %v1219_v34  ;;  %v2679_v38 = vpop.eup %2678 }
 0x4ac   : >> { %2688 = vrcp.f32 %v1225_v28  ;;  %v2681_v55 = vpop.eup %2680 }
 0x4ad   : >> { %2690 = vrcp.f32 %v1221_v44  ;;  %v2683_v7 = vpop.eup %2682 }
 0x4ae   : >> { %v1231_v47 = vpop.xlane.xlu0 %1230  ;;  %v1233_v42 = vpop.xlane.xlu1 %1232 }
 0x4af   : >> { %2692 = vrcp.f32 %v1231_v47 }
 0x4b1   : >> { %v2685_v53 = vpop.eup %2684 }
 0x4b2   : >> { %v1227_v46 = vpop.xlane.xlu0 %1226  ;;  %v1229_v59 = vpop.xlane.xlu1 %1228 }
 0x4b3   : >> { %2694 = vrcp.f32 %v1227_v46 }
 0x4b4   : >> { %2696 = vrcp.f32 %v1233_v42 }
 0x4b5   : >> { %2698 = vrcp.f32 %v1229_v59 }
 0x4b6   : >> { %v1235_v60 = vpop.xlane.xlu0 %1234  ;;  %v1237_v30 = vpop.xlane.xlu1 %1236 }
 0x4ba   : >> { %v1239_v29 = vpop.xlane.xlu0 %1238  ;;  %v1241_v21 = vpop.xlane.xlu1 %1240 }
 0x4bb   : >> { %2700 = vrcp.f32 %v1239_v29 }
 0x4bc   : >> { %2702 = vrcp.f32 %v1235_v60 }
 0x4bd   : >> { %2704 = vrcp.f32 %v1241_v21 }
 0x4be   : >> { %2706 = vrcp.f32 %v1237_v30 }
 0x4e2   : >> { %v2416_v49 = vpop.f32.mrb[32].mxu0 }
 0x4e3   : >> { %v1365_v3 = vmul.f32 %v2677_v48, %v2416_v49  ;;  %v1284_v10 = vpop.f32.mrb[33].mxu0 }
 0x4e4   : >> { %v1363_v37 = vmul.f32 %v2679_v38, %v1284_v10  ;;  %v2417_v51 = vpop.f32.mrb[34].mxu0 }
 0x4e5   : >> { %v3427_v54 = vadd.f32 %v2874_v54, %v1365_v3   ;;  %v1366_v39 = vmul.f32 %v2681_v55, %v2417_v51  ;;  %v1287_v23 = vpop.f32.mrb[35].mxu0 }
 0x4e6   : >> { %v3430_v36 = vadd.f32 %v2882_v36, %v1363_v37   ;;  %v1364_v61 = vmul.f32 %v2683_v7, %v1287_v23 }
 0x4e7   : >> { %v3939_v6 = vmov %v3427_v54  ;;  %v3433_v40 = vadd.f32 %v2870_v40, %v1366_v39   ;;  %v2687_v54 = vpop.eup %2686 }
 0x4e8   : >> { %v3940_v62 = vmov %v3430_v36  ;;  %v3436_v41 = vadd.f32 %v2878_v41, %v1364_v61   ;;  %v2689_v27 = vpop.eup %2688 }
 0x4e9   : >> { %v3941_v50 = vmov %v3433_v40  ;;  %v2691_v56 = vpop.eup %2690 }
 0x4ea   : >> { %v3942_v52 = vmov %v3436_v41  ;;  %v2420_v57 = vpop.f32.mrb[36].mxu0  ;;  %v2693_v44 = vpop.eup %2692  ;;  %v1398_v29 = vadd.f32 (%p3469_p4), %v3941_v50, %v2960_v5 }
 0x4eb   : >> { %v1369_v58 = vmul.f32 %v2685_v53, %v2420_v57  ;;  %v1300_v26 = vpop.f32.mrb[37].mxu0  ;;  %v2695_v42 = vpop.eup %2694 }
 0x4ec   : >> { %v1367_v36 = vmul.f32 %v2687_v54, %v1300_v26  ;;  %v2421_v19 = vpop.f32.mrb[38].mxu0  ;;  %v2697_v48 = vpop.eup %2696 }
 0x4ed   : >> { %v3439_v43 = vadd.f32 %v2858_v43, %v1369_v58   ;;  %v1370_v40 = vmul.f32 %v2689_v27, %v2421_v19  ;;  %v1303_v24 = vpop.f32.mrb[39].mxu0  ;;  %v1397_v19 = vadd.f32 (%p3469_p4), %v3939_v6, %v2950_v1  ;;  %v3543_v1 = vadd.f32 (%p3469_p4), %v3125_v18, %v1398_v29 }
 0x4ee   : >> { %v3442_v45 = vadd.f32 %v2866_v45, %v1367_v36   ;;  %v1368_v41 = vmul.f32 %v2691_v56, %v1303_v24  ;;  %v3968_v36 = vmov %v3940_v62  ;;  %v1396_v56 = vadd.f32 (%p3469_p4), %v3942_v52, %v2953_v2 }
 0x4ef   : >> { %v3943_v25 = vmov %v3439_v43  ;;  %v3445_v22 = vadd.f32 %v2854_v22, %v1370_v40   ;;  %v3965_v40 = vmov %v3941_v50  ;;  %v1395_v36 = vadd.f32 (%p3469_p4), %v3940_v62, %v2947_v0 }
 0x4f0   : >> { %v3944_v20 = vmov %v3442_v45  ;;  %v1384_v34 = vadd.f32 %v2862_v35, %v1368_v41   ;;  %v2699_v45 = vpop.eup %2698  ;;  %v3967_v41 = vmov %v3942_v52  ;;  %v3540_v0 = vadd.f32 (%p3469_p4), %v3125_v18, %v1396_v56 }
 0x4f1   : >> { %v3945_v28 = vmov %v3445_v22  ;;  %v2701_v51 = vpop.eup %2700  ;;  %v1399_v24 = vadd.f32 (%p3469_p4), %v3944_v20, %v2967_v8  ;;  %v1401_v8 = vadd.f32 (%p3469_p4), %v3943_v25, %v2977_v12 }
 0x4f2   : >> { %v2424_v47 = vpop.f32.mrb[40].mxu0  ;;  %v2703_v39 = vpop.eup %2702  ;;  %v1400_v21 = vadd.f32 (%p3469_p4), %v1384_v34, %v2970_v9  ;;  %v1402_v9 = vadd.f32 (%p3469_p4), %v3945_v28, %v2980_v13 }
 0x4f3   : >> { %v1373_v43 = vmul.f32 %v2693_v44, %v2424_v47  ;;  %v1316_v46 = vpop.f32.mrb[41].mxu0  ;;  %v2705_v60 = vpop.eup %2704  ;;  %v3534_v44 = vadd.f32 (%p3469_p4), %v3125_v18, %v1395_v36  ;;  %v3971_v47 = vld [vmem:[#allocation4_spill] sm:$0xff] (%p3469_p4) }
 0x4f4   : >> { %v1371_v49 = vmul.f32 %v2695_v42, %v1316_v46  ;;  %v2425_v38 = vpop.f32.mrb[42].mxu0  ;;  %v2707_v53 = vpop.eup %2706  ;;  %v3567_v12 = vadd.f32 (%p3469_p4), %v3125_v18, %v1402_v9 }
 0x4f5   : >> { %v3449_v63 = vadd.f32 %v2842_v63, %v1373_v43   ;;  %v1374_v3 = vmul.f32 %v2697_v48, %v2425_v38  ;;  %v1319_v22 = vpop.f32.mrb[43].mxu0  ;;  %v3962_v43 = vmov %v3943_v25  ;;  %v1431_v2 = vsel (%p3469_p4), %vm303_vm0, %v3534_v44, 0.0 }
 0x4f6   : >> { %v3452_v14 = vadd.f32 %v2850_v14, %v1371_v49   ;;  %v1372_v35 = vmul.f32 %v2699_v45, %v1319_v22  ;;  %v3961_v22 = vmov %v3945_v28  ;;  %v3964_v45 = vmov %v3944_v20  ;;  %1432 = vadd.xlane.f32.xlu0 (%p3469_p4), %v1431_v2  ;;  %v3969_v28 = vld [vmem:[#allocation2_spill] sm:$0xff] (%p3469_p4)  ;;  %v3972_v43 = vld [vmem:[#allocation5_spill] sm:$0xff] (%p3469_p4) }
 0x4f7   : >> { %v3946_v59 = vmov %v3449_v63  ;;  %v3455_v4 = vadd.f32 %v2838_v4, %v1374_v3   ;;  %v1452_v40 = vsel (%p3469_p4), %vm303_vm0, %v3567_v12, 0.0  ;;  %v3974_v22 = vld [vmem:[#allocation7_spill] sm:$0xff] (%p3469_p4) }
 0x4f8   : >> { %v3947_v10 = vmov %v3452_v14  ;;  %v3458_v33 = vadd.f32 %v2846_v33, %v1372_v35   ;;  %v3963_v35 = vmov %v1384_v34  ;;  %v3970_v34 = vld [vmem:[#allocation3_spill] sm:$0xff] (%p3469_p4) }
 0x4f9   : >> { %v3948_v55 = vmov %v3455_v4  ;;  %v1403_v50 = vadd.f32 (%p3469_p4), %v3947_v10, %v2987_v16  ;;  %v1405_v16 = vadd.f32 (%p3469_p4), %v3946_v59, %v3969_v28 }
 0x4fa   : >> { %v3949_v37 = vmov %v3458_v33  ;;  %v2428_v7 = vpop.f32.mrb[44].mxu0 }
 0x4fb   : >> { %v1377_v23 = vmul.f32 %v2701_v51, %v2428_v7  ;;  %v1332_v61 = vpop.f32.mrb[45].mxu0  ;;  %v3959_v33 = vmov %v3949_v37  ;;  %v1404_v52 = vadd.f32 (%p3469_p4), %v3949_v37, %v2990_v17  ;;  %v3582_v20 = vadd.f32 (%p3469_p4), %v3125_v18, %v1403_v50 }
 0x4fc   : >> { %v1375_v30 = vmul.f32 %v2703_v39, %v1332_v61  ;;  %v2429_v63 = vpop.f32.mrb[46].mxu0  ;;  %565 = sbr.rel (!%p3469_p4) target bundleno = 367 (0x16f), region = 88  ;;  %v3561_v33 = vadd.f32 (%p3469_p4), %v3125_v18, %v1400_v21  ;;  %v1406_v17 = vadd.f32 (%p3469_p4), %v3948_v55, %v3970_v34  ;;  %v3598_v38 = vadd.f32 (%p3469_p4), %v3125_v18, %v1405_v16 }
 0x4fd   : >> { %v3461_v15 = vadd.f32 %v2826_v15, %v1377_v23   ;;  %v1378_v14 = vmul.f32 %v2705_v60, %v2429_v63  ;;  %v1335_v54 = vpop.f32.mrb[47].mxu0  ;;  %v3958_v63 = vmov %v3946_v59  ;;  %v3585_v41 = vadd.f32 (%p3469_p4), %v3125_v18, %v1404_v52  ;;  %v3973_v59 = vld [vmem:[#allocation6_spill] sm:$0xff] (%p3469_p4) }
 0x4fe   : >> { %v1391_v58 = vadd.f32 %v2834_v32, %v1375_v30   ;;  %v1376_v4 = vmul.f32 %v2707_v53, %v1335_v54  ;;  %v3966_v54 = vmov %v3939_v6  ;;  %v3564_v6 = vadd.f32 (%p3469_p4), %v3125_v18, %v1401_v8 }
 0x4ff   : >> { %v3950_v57 = vmov %v3461_v15  ;;  %v3465_v11 = vadd.f32 %v2822_v11, %v1378_v14   ;;  %v3960_v14 = vmov %v3947_v10  ;;  %v1446_v62 = vsel (%p3469_p4), %vm303_vm0, %v3561_v33, 0.0 }
 0x500   : >> { %v1392_v27 = vadd.f32 %v2830_v31, %v1376_v4   ;;  %v3954_v15 = vmov %v3950_v57  ;;  %v3956_v32 = vmov %v1391_v58  ;;  %v3957_v4 = vmov %v3948_v55 }
 0x501   : >> { %v3951_v26 = vmov %v3465_v11  ;;  %v1434_v15 = vsel (%p3469_p4), %vm303_vm0, %v3540_v0, 0.0  ;;  %v3558_v32 = vadd.f32 (%p3469_p4), %v3125_v18, %v1399_v24  ;;  %v1449_v25 = vsel (%p3469_p4), %vm303_vm0, %v3564_v6, 0.0 }
 0x502   : >> { %v3953_v11 = vmov %v3951_v26  ;;  %v3955_v31 = vmov %v1392_v27  ;;  %1435 = vadd.xlane.f32.xlu0 (%p3469_p4), %v1434_v15  ;;  %v1407_v42 = vadd.f32 (%p3469_p4), %v1391_v58, %v3971_v47  ;;  %v1408_v46 = vadd.f32 (%p3469_p4), %v1392_v27, %v3972_v43 }
 0x503   : > { %v3537_v11 = vadd.f32 %v3125_v18, %v1397_v19  ;;  %v1440_v31 = vsel %vm303_vm0, %v3543_v1, 0.0  ;;  %v1443_v13 = vsel %vm303_vm0, %v3558_v32, 0.0  ;;  %v1455_v48 = vsel %vm303_vm0, %v3582_v20, 0.0 }
 0x504   : > { %v1458_v49 = vsel %vm303_vm0, %v3585_v41, 0.0  ;;  %v3601_v45 = vadd.f32 %v3125_v18, %v1406_v17  ;;  %v1409_v3 = vadd.f32 %v3950_v57, %v3973_v59  ;;  %v1410_v10 = vadd.f32 %v3951_v26, %v3974_v22 }
 0x505   : > { %v1437_v5 = vsel %vm303_vm0, %v3537_v11, 0.0  ;;  %v1461_v35 = vsel %vm303_vm0, %v3598_v38, 0.0  ;;  %v3612_v37 = vadd.f32 %v3125_v18, %v1407_v42  ;;  %v3615_v51 = vadd.f32 %v3125_v18, %v1408_v46 }
 0x506   : > { %1438 = vadd.xlane.f32.xlu1 %v1437_v5  ;;  %1444 = vadd.xlane.f32.xlu0 %v1443_v13  ;;  %v1464_v55 = vsel %vm303_vm0, %v3601_v45, 0.0  ;;  %v3622_v23 = vadd.f32 %v3125_v18, %v1409_v3  ;;  %v3625_v61 = vadd.f32 %v3125_v18, %v1410_v10 }
 0x507   : > { %v1467_v7 = vsel %vm303_vm0, %v3612_v37, 0.0  ;;  %v1470_v39 = vsel %vm303_vm0, %v3615_v51, 0.0 }
 0x508   : > { %v1473_v60 = vsel %vm303_vm0, %v3622_v23, 0.0  ;;  %v1476_v30 = vsel %vm303_vm0, %v3625_v61, 0.0 }
 0x50a   : > { %1441 = vadd.xlane.f32.xlu1 %v1440_v31  ;;  %1450 = vadd.xlane.f32.xlu0 %v1449_v25 }
 0x50e   : > { %1447 = vadd.xlane.f32.xlu1 %v1446_v62  ;;  %1456 = vadd.xlane.f32.xlu0 %v1455_v48 }
 0x512   : > { %1453 = vadd.xlane.f32.xlu1 %v1452_v40  ;;  %1462 = vadd.xlane.f32.xlu0 %v1461_v35 }
 0x516   : > { %1459 = vadd.xlane.f32.xlu1 %v1458_v49  ;;  %1468 = vadd.xlane.f32.xlu0 %v1467_v7 }
 0x51a   : > { %1465 = vadd.xlane.f32.xlu1 %v1464_v55  ;;  %1474 = vadd.xlane.f32.xlu0 %v1473_v60 }
 0x51e   : > { %1471 = vadd.xlane.f32.xlu1 %v1470_v39 }
 0x522   : > { %1477 = vadd.xlane.f32.xlu1 %v1476_v30 }
 0x583   : > { %v1433_v63 = vpop.xlane.xlu0 %1432 }
 0x584   : > { %v1479_v57 = vmul.f32 0.03125, %v1433_v63 }
 0x586   : > { %v3632_v54 = vsub.f32 %v3534_v44, %v1479_v57 }
 0x588   : > { %v1511_v36 = vmul.f32 %v3632_v54, %v3632_v54 }
 0x58a   : > { %v1527_v24 = vsel %vm303_vm0, %v1511_v36, 0.0 }
 0x58b   : > { %1528 = vadd.xlane.f32.xlu0 %v1527_v24 }
 0x58f   : > { %v1436_v58 = vpop.xlane.xlu0 %1435 }
 0x590   : > { %v1480_v26 = vmul.f32 0.03125, %v1436_v58 }
 0x592   : > { %v3642_v56 = vsub.f32 %v3540_v0, %v1480_v26 }
 0x593   : > { %v1439_v53 = vpop.xlane.xlu1 %1438  ;;  %v1445_v21 = vpop.xlane.xlu0 %1444 }
 0x594   : > { %v1481_v14 = vmul.f32 0.03125, %v1439_v53  ;;  %v1483_v8 = vmul.f32 0.03125, %v1445_v21  ;;  %v1512_v15 = vmul.f32 %v3642_v56, %v3642_v56 }
 0x596   : > { %v3635_v18 = vsub.f32 %v3537_v11, %v1481_v14  ;;  %v3654_v13 = vsub.f32 %v3558_v32, %v1483_v8  ;;  %v1530_v50 = vsel %vm303_vm0, %v1512_v15, 0.0 }
 0x597   : > { %v1442_v4 = vpop.xlane.xlu1 %1441  ;;  %1531 = vadd.xlane.f32.xlu1 %v1530_v50  ;;  %v1451_v52 = vpop.xlane.xlu0 %1450 }
 0x598   : > { %v1482_v27 = vmul.f32 0.03125, %v1442_v4  ;;  %v1513_v19 = vmul.f32 %v3635_v18, %v3635_v18  ;;  %v1485_v28 = vmul.f32 0.03125, %v1451_v52  ;;  %v1515_v34 = vmul.f32 %v3654_v13, %v3654_v13 }
 0x59a   : > { %v3645_v29 = vsub.f32 %v3543_v1, %v1482_v27  ;;  %v1533_v5 = vsel %vm303_vm0, %v1513_v19, 0.0  ;;  %v3666_v47 = vsub.f32 %v3564_v6, %v1485_v28  ;;  %v1539_v43 = vsel %vm303_vm0, %v1515_v34, 0.0 }
 0x59b   : > { %v1448_v2 = vpop.xlane.xlu1 %1447  ;;  %1534 = vadd.xlane.f32.xlu0 %v1533_v5  ;;  %v1457_v46 = vpop.xlane.xlu0 %1456 }
 0x59c   : > { %v1484_v9 = vmul.f32 0.03125, %v1448_v2  ;;  %v1514_v31 = vmul.f32 %v3645_v29, %v3645_v29  ;;  %v1487_v59 = vmul.f32 0.03125, %v1457_v46  ;;  %v1517_v22 = vmul.f32 %v3666_v47, %v3666_v47 }
 0x59e   : > { %v3657_v62 = vsub.f32 %v3561_v33, %v1484_v9  ;;  %v1536_v40 = vsel %vm303_vm0, %v1514_v31, 0.0  ;;  %v3678_v35 = vsub.f32 %v3582_v20, %v1487_v59  ;;  %v1545_v7 = vsel %vm303_vm0, %v1517_v22, 0.0  ;;  %v2708_v22 = vld [vmem:[%s3891_s5] sm:$0xff]  }
 0x59f   : > { %v1454_v25 = vpop.xlane.xlu1 %1453  ;;  %1537 = vadd.xlane.f32.xlu1 %v1536_v40  ;;  %1540 = vadd.xlane.f32.xlu0 %v1539_v43  ;;  %v1463_v39 = vpop.xlane.xlu0 %1462 }
 0x5a0   : > { %v1486_v16 = vmul.f32 0.03125, %v1454_v25  ;;  %v1516_v17 = vmul.f32 %v3657_v62, %v3657_v62  ;;  %v1489_v63 = vmul.f32 0.03125, %v1463_v39  ;;  %v1519_v57 = vmul.f32 %v3678_v35, %v3678_v35  ;;  %2430 = vmatprep.subr.bf16.mxu0 %v2708_v22 }
 0x5a1   : > { %2431 = vmatpush3.bf16.msra.mxu0 %v2708_v22 }
 0x5a2   : > { %v3669_v42 = vsub.f32 %v3567_v12, %v1486_v16  ;;  %v1542_v49 = vsel %vm303_vm0, %v1516_v17, 0.0  ;;  %v3690_v58 = vsub.f32 %v3598_v38, %v1489_v63  ;;  %v1551_v26 = vsel %vm303_vm0, %v1519_v57, 0.0 }
 0x5a3   : > { %v1460_v48 = vpop.xlane.xlu1 %1459  ;;  %1543 = vadd.xlane.f32.xlu1 %v1542_v49  ;;  %1546 = vadd.xlane.f32.xlu0 %v1545_v7  ;;  %v1469_v27 = vpop.xlane.xlu0 %1468 }
 0x5a4   : > { %v1488_v3 = vmul.f32 0.03125, %v1460_v48  ;;  %v1518_v10 = vmul.f32 %v3669_v42, %v3669_v42  ;;  %v1491_v24 = vmul.f32 0.03125, %v1469_v27  ;;  %v1521_v2 = vmul.f32 %v3690_v58, %v3690_v58 }
 0x5a6   : > { %v3681_v55 = vsub.f32 %v3585_v41, %v1488_v3  ;;  %v1548_v30 = vsel %vm303_vm0, %v1518_v10, 0.0  ;;  %v3702_v8 = vsub.f32 %v3612_v37, %v1491_v24  ;;  %v1557_v15 = vsel %vm303_vm0, %v1521_v2, 0.0  ;;  %v2709_v10 = vld [vmem:[%s3891_s5 + $0x8] sm:$0xff]  }
 0x5a7   : > { %v1466_v60 = vpop.xlane.xlu1 %1465  ;;  %1549 = vadd.xlane.f32.xlu1 %v1548_v30  ;;  %1552 = vadd.xlane.f32.xlu0 %v1551_v26  ;;  %v1475_v31 = vpop.xlane.xlu0 %1474 }
 0x5a8   : > { %v1490_v53 = vmul.f32 0.03125, %v1466_v60  ;;  %v1520_v14 = vmul.f32 %v3681_v55, %v3681_v55  ;;  %v1493_v25 = vmul.f32 0.03125, %v1475_v31  ;;  %v1523_v28 = vmul.f32 %v3702_v8, %v3702_v8  ;;  %2432 = vmatprep.subr.bf16.mxu0 %v2709_v10 }
 0x5a9   : > { %2433 = vmatpush3.bf16.msra.mxu0 %v2709_v10 }
 0x5aa   : > { %v3693_v4 = vsub.f32 %v3601_v45, %v1490_v53  ;;  %v1554_v19 = vsel %vm303_vm0, %v1520_v14, 0.0  ;;  %v3714_v34 = vsub.f32 %v3622_v23, %v1493_v25  ;;  %v1563_v43 = vsel %vm303_vm0, %v1523_v28, 0.0 }
 0x5ab   : > { %v1472_v36 = vpop.xlane.xlu1 %1471  ;;  %1555 = vadd.xlane.f32.xlu1 %v1554_v19  ;;  %1558 = vadd.xlane.f32.xlu0 %v1557_v15 }
 0x5ac   : > { %v1492_v21 = vmul.f32 0.03125, %v1472_v36  ;;  %v1522_v5 = vmul.f32 %v3693_v4, %v3693_v4  ;;  %v1525_v48 = vmul.f32 %v3714_v34, %v3714_v34 }
 0x5ae   : > { %v3705_v9 = vsub.f32 %v3615_v51, %v1492_v21  ;;  %v1560_v52 = vsel %vm303_vm0, %v1522_v5, 0.0  ;;  %v1569_v59 = vsel %vm303_vm0, %v1525_v48, 0.0 }
 0x5af   : > { %v1478_v50 = vpop.xlane.xlu1 %1477  ;;  %1561 = vadd.xlane.f32.xlu1 %v1560_v52  ;;  %1564 = vadd.xlane.f32.xlu0 %v1563_v43 }
 0x5b0   : > { %v1494_v40 = vmul.f32 0.03125, %v1478_v50  ;;  %v1524_v16 = vmul.f32 %v3705_v9, %v3705_v9 }
 0x5b2   : > { %v3717_v17 = vsub.f32 %v3625_v61, %v1494_v40  ;;  %v1566_v46 = vsel %vm303_vm0, %v1524_v16, 0.0 }
 0x5b3   : > { %1567 = vadd.xlane.f32.xlu1 %v1566_v46  ;;  %1570 = vadd.xlane.f32.xlu0 %v1569_v59 }
 0x5b4   : > { %v1526_v49 = vmul.f32 %v3717_v17, %v3717_v17 }
 0x5b6   : > { %v1572_v3 = vsel %vm303_vm0, %v1526_v49, 0.0 }
 0x5b7   : > { %1573 = vadd.xlane.f32.xlu1 %v1572_v3 }
 0x618   : > { %v1529_v7 = vpop.xlane.xlu0 %1528 }
 0x619   : > { %v1575_v39 = vmul.f32 0.03125, %v1529_v7 }
 0x61b   : > { %v1591_v60 = vadd.f32 1e-05, %v1575_v39 }
 0x61d   : > { %2712 = vrsqrt.f32 %v1591_v60  ;;  %v3975_v60 = vld [vmem:[#allocation8_spill] sm:$0xff] }
 0x624   : > { %v1532_v30 = vpop.xlane.xlu1 %1531 }
 0x625   : > { %v1576_v53 = vmul.f32 0.03125, %v1532_v30 }
 0x627   : > { %v1592_v14 = vadd.f32 1e-05, %v1576_v53  ;;  %v2713_v52 = vpop.eup %2712 }
 0x628   : > { %v1535_v63 = vpop.xlane.xlu0 %1534  ;;  %v1623_v43 = vmul.f32 %v2713_v52, %v3632_v54 }
 0x629   : > { %v1577_v57 = vmul.f32 0.03125, %v1535_v63  ;;  %2714 = vrsqrt.f32 %v1592_v14 }
 0x62a   : > { %v1643_v30 = vmul.f32 %v3975_v60, %v1623_v43 }
 0x62b   : > { %v1593_v26 = vadd.f32 1e-05, %v1577_v57 }
 0x62c   : > { %v1538_v27 = vpop.xlane.xlu1 %1537  ;;  %v1541_v36 = vpop.xlane.xlu0 %1540 }
 0x62d   : > { %v1578_v19 = vmul.f32 0.03125, %v1538_v27  ;;  %v1579_v24 = vmul.f32 0.03125, %v1541_v36  ;;  %2716 = vrsqrt.f32 %v1593_v26 }
 0x62f   : > { %v1594_v21 = vadd.f32 1e-05, %v1578_v19  ;;  %v1595_v2 = vadd.f32 1e-05, %v1579_v24 }
 0x630   : > { %v1544_v5 = vpop.xlane.xlu1 %1543  ;;  %v1547_v15 = vpop.xlane.xlu0 %1546 }
 0x631   : > { %2718 = vrsqrt.f32 %v1594_v21  ;;  %v1580_v31 = vmul.f32 0.03125, %v1544_v5  ;;  %v1581_v50 = vmul.f32 0.03125, %v1547_v15  ;;  %v3976_v21 = vld [vmem:[#allocation9_spill] sm:$0xff] }
 0x632   : > { %2720 = vrsqrt.f32 %v1595_v2  ;;  %v1663_v2 = vadd.f32 %v3976_v21, %v1643_v30 }
 0x633   : > { %v1596_v25 = vadd.f32 1e-05, %v1580_v31  ;;  %v1597_v40 = vadd.f32 1e-05, %v1581_v50  ;;  %v2715_v49 = vpop.eup %2714 }
 0x634   : > { %v1550_v28 = vpop.xlane.xlu1 %1549  ;;  %v1553_v16 = vpop.xlane.xlu0 %1552  ;;  %v1624_v39 = vmul.f32 %v2715_v49, %v3642_v56 }
 0x635   : > { %2722 = vrsqrt.f32 %v1596_v25  ;;  %v1582_v46 = vmul.f32 0.03125, %v1550_v28  ;;  %v1583_v48 = vmul.f32 0.03125, %v1553_v16 }
 0x636   : > { %2724 = vrsqrt.f32 %v1597_v40  ;;  %v1644_v54 = vmul.f32 %v3975_v60, %v1624_v39 }
 0x637   : > { %v1598_v59 = vadd.f32 1e-05, %v1582_v46  ;;  %v1599_v3 = vadd.f32 1e-05, %v1583_v48  ;;  %v2717_v22 = vpop.eup %2716 }
 0x638   : > { %v1556_v10 = vpop.xlane.xlu1 %1555  ;;  %v1559_v7 = vpop.xlane.xlu0 %1558  ;;  %v1625_v57 = vmul.f32 %v2717_v22, %v3635_v18  ;;  %v1664_v56 = vadd.f32 %v3976_v21, %v1644_v54 }
 0x639   : > { %2726 = vrsqrt.f32 %v1598_v59  ;;  %v1584_v63 = vmul.f32 0.03125, %v1556_v10  ;;  %v1585_v53 = vmul.f32 0.03125, %v1559_v7 }
 0x63a   : > { %2728 = vrsqrt.f32 %v1599_v3  ;;  %v1645_v15 = vmul.f32 %v3975_v60, %v1625_v57  ;;  %v1679_v50 = vpack.c.bf16 %v1664_v56, %v1663_v2 }
 0x63b   : > { %v2719_v14 = vpop.eup %2718  ;;  %v1600_v26 = vadd.f32 1e-05, %v1584_v63  ;;  %v1601_v27 = vadd.f32 1e-05, %v1585_v53 }
 0x63c   : > { %v2721_v36 = vpop.eup %2720  ;;  %v1562_v19 = vpop.xlane.xlu1 %1561  ;;  %v1626_v5 = vmul.f32 %v2719_v14, %v3645_v29  ;;  %2434 = vmatprep.mubr.msk.bf16.mxu0 %vm303_vm0, %v1679_v50  ;;  %v1665_v29 = vadd.f32 %v3976_v21, %v1645_v15 }
 0x63d   : > { %v1565_v24 = vpop.xlane.xlu0 %1564  ;;  %2730 = vrsqrt.f32 %v1600_v26  ;;  %v1586_v31 = vmul.f32 0.03125, %v1562_v19  ;;  %v1627_v25 = vmul.f32 %v2721_v36, %v3654_v13 }
 0x63e   : > { %v1587_v18 = vmul.f32 0.03125, %v1565_v24  ;;  %2732 = vrsqrt.f32 %v1601_v27  ;;  %v1646_v52 = vmul.f32 %v3975_v60, %v1626_v5 }
 0x63f   : > { %v2723_v40 = vpop.eup %2722  ;;  %v1602_v28 = vadd.f32 1e-05, %v1586_v31  ;;  %v1647_v3 = vmul.f32 %v3975_v60, %v1627_v25 }
 0x640   : > { %v1603_v16 = vadd.f32 1e-05, %v1587_v18  ;;  %v2725_v43 = vpop.eup %2724  ;;  %v1568_v46 = vpop.xlane.xlu1 %1567  ;;  %v1666_v49 = vadd.f32 %v3976_v21, %v1646_v52  ;;  %v1628_v59 = vmul.f32 %v2723_v40, %v3657_v62 }
 0x641   : > { %v1571_v48 = vpop.xlane.xlu0 %1570  ;;  %2734 = vrsqrt.f32 %v1602_v28  ;;  %v1588_v22 = vmul.f32 0.03125, %v1568_v46  ;;  %v1629_v13 = vmul.f32 %v2725_v43, %v3666_v47  ;;  %v1667_v62 = vadd.f32 %v3976_v21, %v1647_v3 }
 0x642   : > { %v1589_v10 = vmul.f32 0.03125, %v1571_v48  ;;  %2736 = vrsqrt.f32 %v1603_v16  ;;  %v1680_v7 = vpack.c.bf16 %v1666_v49, %v1665_v29  ;;  %v1648_v39 = vmul.f32 %v3975_v60, %v1628_v59 }
 0x643   : > { %v2727_v30 = vpop.eup %2726  ;;  %v1604_v63 = vadd.f32 1e-05, %v1588_v22  ;;  %v1649_v27 = vmul.f32 %v3975_v60, %v1629_v13 }
 0x644   : > { %v1605_v53 = vadd.f32 1e-05, %v1589_v10  ;;  %v2729_v57 = vpop.eup %2728  ;;  %v1574_v54 = vpop.xlane.xlu1 %1573  ;;  %2435 = vmatmul.mubr.msk.bf16.vlgmr.msra.gmra.mrb[0].mxu0 %vm303_vm0, %v1680_v7  ;;  %v1668_v14 = vadd.f32 %v3976_v21, %v1648_v39  ;;  %v1630_v26 = vmul.f32 %v2727_v30, %v3669_v42 }
 0x645   : > { %2738 = vrsqrt.f32 %v1604_v63  ;;  %v1590_v47 = vmul.f32 0.03125, %v1574_v54  ;;  %v1631_v36 = vmul.f32 %v2729_v57, %v3678_v35  ;;  %v1669_v15 = vadd.f32 %v3976_v21, %v1649_v27 }
 0x646   : > { %2740 = vrsqrt.f32 %v1605_v53  ;;  %v1681_v19 = vpack.c.bf16 %v1668_v14, %v1667_v62  ;;  %v1650_v24 = vmul.f32 %v3975_v60, %v1630_v26  ;;  %v2710_v14 = vld [vmem:[%s3892_s6] sm:$0xff]  }
 0x647   : > { %v2731_v2 = vpop.eup %2730  ;;  %v1606_v56 = vadd.f32 1e-05, %v1590_v47  ;;  %v1651_v18 = vmul.f32 %v3975_v60, %v1631_v36  ;;  %2450 = vmatprep.subr.bf16.mxu1 %v2710_v14  ;;  %v3977_v26 = vld [vmem:[#allocation10_spill] sm:$0xff] }
 0x648   : > { %v2733_v5 = vpop.eup %2732  ;;  %2438 = vmatprep.mubr.msk.bf16.mxu0 %vm303_vm0, %v1681_v19  ;;  %v1670_v31 = vadd.f32 %v3976_v21, %v1650_v24  ;;  %v1632_v42 = vmul.f32 %v2731_v2, %v3681_v55  ;;  %2451 = vmatpush3.bf16.msra.mxu1 %v2710_v14 }
 0x649   : > { %2742 = vrsqrt.f32 %v1606_v56  ;;  %v1633_v35 = vmul.f32 %v2733_v5, %v3690_v58  ;;  %v1671_v28 = vadd.f32 %v3976_v21, %v1651_v18 }
 0x64a   : > { %v1682_v50 = vpack.c.bf16 %v1670_v31, %v1669_v15  ;;  %v1652_v52 = vmul.f32 %v3975_v60, %v1632_v42 }
 0x64b   : > { %v2735_v25 = vpop.eup %2734  ;;  %v1653_v55 = vmul.f32 %v3975_v60, %v1633_v35 }
 0x64c   : > { %v2737_v40 = vpop.eup %2736  ;;  %2439 = vmatmul.mubr.msk.bf16.gmra.mrb[4].mxu0 %vm303_vm0, %v1682_v50  ;;  %v1672_v16 = vadd.f32 %v3976_v21, %v1652_v52  ;;  %v1634_v43 = vmul.f32 %v2735_v25, %v3693_v4 }
 0x64d   : > { %v1635_v46 = vmul.f32 %v2737_v40, %v3702_v8  ;;  %v1673_v59 = vadd.f32 %v3976_v21, %v1653_v55 }
 0x64e   : > { %v1683_v48 = vpack.c.bf16 %v1672_v16, %v1671_v28  ;;  %v1654_v58 = vmul.f32 %v3975_v60, %v1634_v43 }
 0x64f   : > { %v2739_v29 = vpop.eup %2738  ;;  %v1655_v10 = vmul.f32 %v3975_v60, %v1635_v46 }
 0x650   : > { %v2741_v49 = vpop.eup %2740  ;;  %2442 = vmatprep.mubr.msk.bf16.mxu0 %vm303_vm0, %v1683_v48  ;;  %v1674_v3 = vadd.f32 %v3976_v21, %v1654_v58  ;;  %v1636_v22 = vmul.f32 %v2739_v29, %v3705_v9 }
 0x651   : > { %v1637_v4 = vmul.f32 %v2741_v49, %v3714_v34  ;;  %v1675_v39 = vadd.f32 %v3976_v21, %v1655_v10 }
 0x652   : > { %v1684_v13 = vpack.c.bf16 %v1674_v3, %v1673_v59  ;;  %v1656_v8 = vmul.f32 %v3975_v60, %v1636_v22 }
 0x653   : > { %v2743_v7 = vpop.eup %2742  ;;  %v1657_v53 = vmul.f32 %v3975_v60, %v1637_v4 }
 0x654   : > { %2443 = vmatmul.mubr.msk.bf16.gmra.mrb[8].mxu0 %vm303_vm0, %v1684_v13  ;;  %v1676_v30 = vadd.f32 %v3976_v21, %v1656_v8  ;;  %v1638_v63 = vmul.f32 %v2743_v7, %v3717_v17  ;;  %v2711_v17 = vld [vmem:[%s3892_s6 + $0x8] sm:$0xff]  }
 0x655   : > { %v1677_v34 = vadd.f32 %v3976_v21, %v1657_v53  ;;  %2452 = vmatprep.subr.bf16.mxu1 %v2711_v17 }
 0x656   : > { %v1685_v57 = vpack.c.bf16 %v1676_v30, %v1675_v39  ;;  %v1658_v9 = vmul.f32 %v3975_v60, %v1638_v63  ;;  %2453 = vmatpush3.bf16.msra.mxu1 %v2711_v17 }
 0x658   : > { %2446 = vmatprep.mubr.msk.bf16.mxu0 %vm303_vm0, %v1685_v57  ;;  %v1678_v54 = vadd.f32 %v3976_v21, %v1658_v9 }
 0x65a   : > { %v1686_v62 = vpack.c.bf16 %v1678_v54, %v1677_v34 }
 0x65c   : > { %2447 = vmatmul.mubr.msk.bf16.gmra.mrb[12].mxu0 %vm303_vm0, %v1686_v62 }
 0x717   : > { %v2436_v60 = vpop.f32.mrb[0].mxu0 }
 0x718   : > { %v1774_v27 = vadd.f32 %v2436_v60, %v3977_v26  ;;  %v1765_v47 = vpop.f32.mrb[1].mxu0 }
 0x719   : > { %v1766_v21 = vadd.f32 %v3977_v26, %v1765_v47  ;;  %v2437_v36 = vpop.f32.mrb[2].mxu0 }
 0x71a   : > { %v1777_v19 = vadd.f32 %v2437_v36, %v3977_v26  ;;  %v1768_v24 = vpop.f32.mrb[3].mxu0  ;;  %v1830_v56 = vmax.f32 %v1774_v27, 0.0 }
 0x71b   : > { %v1769_v2 = vadd.f32 %v3977_v26, %v1768_v24  ;;  %v1828_v15 = vmax.f32 %v1766_v21, 0.0 }
 0x71c   : > { %v1831_v5 = vmax.f32 %v1777_v19, 0.0 }
 0x71d   : > { %v1829_v31 = vmax.f32 %v1769_v2, 0.0 }
 0x71e   : > { %v1845_v42 = vpack.c.bf16 %v1831_v5, %v1830_v56 }
 0x71f   : > { %v2440_v18 = vpop.f32.mrb[4].mxu0  ;;  %v1844_v35 = vpack.c.bf16 %v1829_v31, %v1828_v15  ;;  %v3978_v15 = vld [vmem:[#allocation11_spill] sm:$0xff] }
 0x720   : > { %v1790_v50 = vadd.f32 %v2440_v18, %v3977_v26  ;;  %v1781_v52 = vpop.f32.mrb[5].mxu0 }
 0x721   : > { %v1782_v25 = vadd.f32 %v3977_v26, %v1781_v52  ;;  %v2441_v40 = vpop.f32.mrb[6].mxu0  ;;  %2454 = vmatprep.mubr.msk.bf16.mxu1 %vm303_vm0, %v1844_v35 }
 0x722   : > { %v1793_v28 = vadd.f32 %v2441_v40, %v3977_v26  ;;  %v1784_v16 = vpop.f32.mrb[7].mxu0  ;;  %2455 = vmatmul.mubr.msk.bf16.vlgmr.msra.gmra.mrb[0].mxu1 %vm303_vm0, %v1845_v42  ;;  %v1834_v55 = vmax.f32 %v1790_v50, 0.0 }
 0x723   : > { %v1785_v43 = vadd.f32 %v3977_v26, %v1784_v16  ;;  %v1832_v48 = vmax.f32 %v1782_v25, 0.0 }
 0x724   : > { %v1835_v46 = vmax.f32 %v1793_v28, 0.0 }
 0x725   : > { %v1833_v58 = vmax.f32 %v1785_v43, 0.0 }
 0x726   : > { %v1847_v29 = vpack.c.bf16 %v1835_v46, %v1834_v55 }
 0x727   : > { %v1846_v49 = vpack.c.bf16 %v1833_v58, %v1832_v48  ;;  %v2444_v59 = vpop.f32.mrb[8].mxu0 }
 0x728   : > { %v1806_v3 = vadd.f32 %v2444_v59, %v3977_v26  ;;  %v1797_v22 = vpop.f32.mrb[9].mxu0 }
 0x729   : > { %v1798_v10 = vadd.f32 %v3977_v26, %v1797_v22  ;;  %v2445_v4 = vpop.f32.mrb[10].mxu0  ;;  %2458 = vmatprep.mubr.msk.bf16.mxu1 %vm303_vm0, %v1846_v49 }
 0x72a   : > { %v1809_v13 = vadd.f32 %v2445_v4, %v3977_v26  ;;  %v1800_v8 = vpop.f32.mrb[11].mxu0  ;;  %2459 = vmatmul.mubr.msk.bf16.gmra.mrb[4].mxu1 %vm303_vm0, %v1847_v29  ;;  %v1838_v39 = vmax.f32 %v1806_v3, 0.0 }
 0x72b   : > { %v1801_v7 = vadd.f32 %v3977_v26, %v1800_v8  ;;  %v1836_v63 = vmax.f32 %v1798_v10, 0.0 }
 0x72c   : > { %v1839_v30 = vmax.f32 %v1809_v13, 0.0 }
 0x72d   : > { %v1837_v53 = vmax.f32 %v1801_v7, 0.0 }
 0x72e   : > { %v1849_v57 = vpack.c.bf16 %v1839_v30, %v1838_v39 }
 0x72f   : > { %v1848_v9 = vpack.c.bf16 %v1837_v53, %v1836_v63  ;;  %v2448_v34 = vpop.f32.mrb[12].mxu0 }
 0x730   : > { %v1822_v54 = vadd.f32 %v2448_v34, %v3977_v26  ;;  %v1813_v62 = vpop.f32.mrb[13].mxu0 }
 0x731   : > { %v1814_v14 = vadd.f32 %v3977_v26, %v1813_v62  ;;  %v2449_v17 = vpop.f32.mrb[14].mxu0  ;;  %2462 = vmatprep.mubr.msk.bf16.mxu1 %vm303_vm0, %v1848_v9 }
 0x732   : > { %v1825_v60 = vadd.f32 %v2449_v17, %v3977_v26  ;;  %v1816_v27 = vpop.f32.mrb[15].mxu0  ;;  %2463 = vmatmul.mubr.msk.bf16.gmra.mrb[8].mxu1 %vm303_vm0, %v1849_v57  ;;  %v1842_v21 = vmax.f32 %v1822_v54, 0.0 }
 0x733   : > { %v1817_v47 = vadd.f32 %v3977_v26, %v1816_v27  ;;  %v1840_v19 = vmax.f32 %v1814_v14, 0.0 }
 0x734   : > { %v1843_v36 = vmax.f32 %v1825_v60, 0.0 }
 0x735   : > { %v1841_v24 = vmax.f32 %v1817_v47, 0.0 }
 0x736   : > { %v1851_v2 = vpack.c.bf16 %v1843_v36, %v1842_v21 }
 0x737   : > { %v1850_v56 = vpack.c.bf16 %v1841_v24, %v1840_v19 }
 0x739   : > { %2466 = vmatprep.mubr.msk.bf16.mxu1 %vm303_vm0, %v1850_v56 }
 0x73a   : > { %2467 = vmatmul.mubr.msk.bf16.gmra.mrb[12].mxu1 %vm303_vm0, %v1851_v2 }
 0x7f5   : > { %v2456_v5 = vpop.f32.mrb[0].mxu1 }
 0x7f6   : > { %v1939_v31 = vadd.f32 %v2456_v5, %v3978_v15  ;;  %v1930_v42 = vpop.f32.mrb[1].mxu1 }
 0x7f7   : > { %v1931_v26 = vadd.f32 %v3978_v15, %v1930_v42  ;;  %v2457_v18 = vpop.f32.mrb[2].mxu1 }
 0x7f8   : > { %v1995_v35 = vadd.f32 %v1939_v31, %v3537_v11  ;;  %v1942_v50 = vadd.f32 %v2457_v18, %v3978_v15  ;;  %v1933_v52 = vpop.f32.mrb[3].mxu1 }
 0x7f9   : > { %v1993_v25 = vadd.f32 %v1931_v26, %v3534_v44  ;;  %v1934_v40 = vadd.f32 %v3978_v15, %v1933_v52 }
 0x7fa   : > { %2011 = vst.msk [vmem:[%s2944_s9 + $0x10] sm:$0xff] %vm303_vm0, %v1995_v35  ;;  %v1996_v28 = vadd.f32 %v1942_v50, %v3543_v1 }
 0x7fb   : > { %2009 = vst.msk [vmem:[%s2944_s9] sm:$0xff] %vm303_vm0, %v1993_v25  ;;  %v1994_v16 = vadd.f32 %v1934_v40, %v3540_v0 }
 0x7fc   : > { %2012 = vst.msk [vmem:[%s2944_s9 + $0x18] sm:$0xff] %vm303_vm0, %v1996_v28 }
 0x7fd   : > { %2010 = vst.msk [vmem:[%s2944_s9 + $0x8] sm:$0xff] %vm303_vm0, %v1994_v16  ;;  %v2460_v11 = vpop.f32.mrb[4].mxu1 }
 0x7fe   : > { %v1955_v44 = vadd.f32 %v2460_v11, %v3978_v15  ;;  %v1946_v43 = vpop.f32.mrb[5].mxu1 }
 0x7ff   : > { %v1947_v55 = vadd.f32 %v3978_v15, %v1946_v43  ;;  %v2461_v46 = vpop.f32.mrb[6].mxu1 }
 0x800   : > { %v1999_v1 = vadd.f32 %v1955_v44, %v3564_v6  ;;  %v1958_v48 = vadd.f32 %v2461_v46, %v3978_v15  ;;  %v1949_v58 = vpop.f32.mrb[7].mxu1 }
 0x801   : > { %v1997_v0 = vadd.f32 %v1947_v55, %v3558_v32  ;;  %v1950_v29 = vadd.f32 %v3978_v15, %v1949_v58 }
 0x802   : > { %2015 = vst.msk [vmem:[%s2944_s9 + $0x30] sm:$0xff] %vm303_vm0, %v1999_v1  ;;  %v2000_v49 = vadd.f32 %v1958_v48, %v3567_v12 }
 0x803   : > { %2013 = vst.msk [vmem:[%s2944_s9 + $0x20] sm:$0xff] %vm303_vm0, %v1997_v0  ;;  %v1998_v59 = vadd.f32 %v1950_v29, %v3561_v33 }
 0x804   : > { %2016 = vst.msk [vmem:[%s2944_s9 + $0x38] sm:$0xff] %vm303_vm0, %v2000_v49 }
 0x805   : > { %2014 = vst.msk [vmem:[%s2944_s9 + $0x28] sm:$0xff] %vm303_vm0, %v1998_v59  ;;  %v2464_v6 = vpop.f32.mrb[8].mxu1 }
 0x806   : > { %v1971_v32 = vadd.f32 %v2464_v6, %v3978_v15  ;;  %v1962_v3 = vpop.f32.mrb[9].mxu1 }
 0x807   : > { %v1963_v22 = vadd.f32 %v3978_v15, %v1962_v3  ;;  %v2465_v10 = vpop.f32.mrb[10].mxu1 }
 0x808   : > { %v2003_v12 = vadd.f32 %v1971_v32, %v3598_v38  ;;  %v1974_v4 = vadd.f32 %v2465_v10, %v3978_v15  ;;  %v1965_v13 = vpop.f32.mrb[11].mxu1 }
 0x809   : > { %v2001_v33 = vadd.f32 %v1963_v22, %v3582_v20  ;;  %v1966_v8 = vadd.f32 %v3978_v15, %v1965_v13 }
 0x80a   : > { %2019 = vst.msk [vmem:[%s2944_s9 + $0x50] sm:$0xff] %vm303_vm0, %v2003_v12  ;;  %v2004_v7 = vadd.f32 %v1974_v4, %v3601_v45 }
 0x80b   : > { %2017 = vst.msk [vmem:[%s2944_s9 + $0x40] sm:$0xff] %vm303_vm0, %v2001_v33  ;;  %v2002_v39 = vadd.f32 %v1966_v8, %v3585_v41 }
 0x80c   : > { %2020 = vst.msk [vmem:[%s2944_s9 + $0x58] sm:$0xff] %vm303_vm0, %v2004_v7 }
 0x80d   : > { %2018 = vst.msk [vmem:[%s2944_s9 + $0x48] sm:$0xff] %vm303_vm0, %v2002_v39  ;;  %v2468_v38 = vpop.f32.mrb[12].mxu1 }
 0x80e   : > { %v1987_v20 = vadd.f32 %v2468_v38, %v3978_v15  ;;  %v1978_v30 = vpop.f32.mrb[13].mxu1 }
 0x80f   : > { %v1979_v63 = vadd.f32 %v3978_v15, %v1978_v30  ;;  %v2469_v53 = vpop.f32.mrb[14].mxu1 }
 0x810   : > { %v2007_v45 = vadd.f32 %v1987_v20, %v3622_v23  ;;  %v1990_v57 = vadd.f32 %v2469_v53, %v3978_v15  ;;  %v1981_v9 = vpop.f32.mrb[15].mxu1 }
 0x811   : > { %v2005_v41 = vadd.f32 %v1979_v63, %v3612_v37  ;;  %v1982_v34 = vadd.f32 %v3978_v15, %v1981_v9 }
 0x812   : > { %2023 = vst.msk [vmem:[%s2944_s9 + $0x70] sm:$0xff] %vm303_vm0, %v2007_v45  ;;  %v2008_v54 = vadd.f32 %v1990_v57, %v3625_v61 }
 0x813   : > { %2021 = vst.msk [vmem:[%s2944_s9 + $0x60] sm:$0xff] %vm303_vm0, %v2005_v41  ;;  %v2006_v62 = vadd.f32 %v1982_v34, %v3615_v51 }
 0x814   : > { %2024 = vst.msk [vmem:[%s2944_s9 + $0x78] sm:$0xff] %vm303_vm0, %v2008_v54 }
 0x815   : > { %2022 = vst.msk [vmem:[%s2944_s9 + $0x68] sm:$0xff] %vm303_vm0, %v2006_v62 }
 0x816 PF: > { %s17_s24 = sadd.s32 1, %s2818_s24  }
 0x817   : > { %p14_p5 = scmp.ge.s32.totalorder %s17_s24, 6  }
 0x819   :  { %16 = sbr.rel (!%p14_p5) target bundleno = 1 (0x1), region = 99 }

</bundles_post_ra>
